<compile_context>
chip_gen: v7x
topology: tpu7x:2x2x1
jax: 0.10.0
libtpu: 0.0.40
codegen_flags: <defaults>
</compile_context>

<pallas_src>
import jax
import jax.numpy as jnp
from jax.experimental import pallas as pl
from jax.experimental.pallas import tpu as pltpu

BN_EPS = 1e-5
GIN_EPS = 0.0          # GINEConv eps (train_eps=False -> 0.0)
LANE = 128             # TPU lane width


# ---------------------------------------------------------------------------
# Fused Pallas kernel (one graph-block per grid step):
# encoders -> n_layers x GINEConv -> add-pool -> fc_out
# ---------------------------------------------------------------------------
def _gin_fused_kernel(
    x_ref, ea_ref, src_ref, dstT_ref, batT_ref,
    node_w_ref, node_b_ref, edge_w_ref, edge_b_ref,
    w1_ref, b1_ref, w2_ref, b2_ref,
    out_w_ref, out_b_ref,
    o_ref,
):
    n_edges = src_ref.shape[0]
    n_nodes = x_ref.shape[0]
    n_graphs = o_ref.shape[0]
    n_layers = w1_ref.shape[0]
    f32, bf16 = jnp.float32, jnp.bfloat16

    # --- gather / scatter / pool selectors built in-kernel from int32 indices ---
    # Scatter/pool selectors are constructed directly in transposed form (iota over
    # the row dim, indices supplied as (1,E)/(1,N)) so the contractions below are
    # plain row-major jnp.dot: no XLU transpose / VMEM re-layout per layer.
    # 0/1 selectors are exact in bf16 -> bf16 MXU path, half the VMEM footprint.
    src_oh = jnp.where(
        jax.lax.broadcasted_iota(jnp.int32, (n_edges, n_nodes), 1) == src_ref[...],
        1.0, 0.0).astype(bf16)                                      # (E, N) gather
    dst_ohT = jnp.where(
        jax.lax.broadcasted_iota(jnp.int32, (n_nodes, n_edges), 0) == dstT_ref[...],
        1.0, 0.0).astype(bf16)                                      # (N, E) scatter-add
    pool_ohT = jnp.where(
        jax.lax.broadcasted_iota(jnp.int32, (n_graphs, n_nodes), 0) == batT_ref[...],
        1.0, 0.0).astype(bf16)                                      # (G, N) add-pool

    # --- encoders (Linear).  bf16 only at the MXU operand boundary; elementwise
    #     work stays f32 (v5e VPU/EUP have no bf16). ---
    h = jnp.dot(x_ref[...].astype(bf16), node_w_ref[...],
                preferred_element_type=f32) + node_b_ref[...]
    ea = jnp.dot(ea_ref[...].astype(bf16), edge_w_ref[...],
                 preferred_element_type=f32) + edge_b_ref[...]

    # --- GINE layers; h stays resident in VMEM/vregs across the unrolled loop ---
    for layer in range(n_layers):
        # message: ReLU(x_src + edge_emb), gathered via one-hot contraction (MXU)
        x_src = jnp.dot(src_oh, h.astype(bf16), preferred_element_type=f32)
        msg = jnp.maximum(x_src + ea, 0.0)
        # sum-aggregate messages at destination nodes (transposed scatter selector)
        agg = jnp.dot(dst_ohT, msg.astype(bf16), preferred_element_type=f32)
        hh = (1.0 + GIN_EPS) * h + agg
        # MLP: Linear (eval-BN folded in) -> ReLU -> Linear, then the outer ReLU.
        # Dropout is identity in eval mode.
        h1 = jnp.maximum(
            jnp.dot(hh.astype(bf16), w1_ref[layer],
                    preferred_element_type=f32) + b1_ref[layer], 0.0)
        h2 = jnp.dot(h1.astype(bf16), w2_ref[layer],
                     preferred_element_type=f32) + b2_ref[layer]
        h = jnp.maximum(h2, 0.0)

    # --- global_add_pool + fc_out (output is lane-padded -> unmasked stores) ---
    pooled = jnp.dot(pool_ohT, h.astype(bf16), preferred_element_type=f32)
    o_ref[...] = jnp.dot(pooled.astype(bf16), out_w_ref[...],
                         preferred_element_type=f32) + out_b_ref[...]


# ---------------------------------------------------------------------------
# Generation-aware VMEM budget: ~100 MiB on v5e/v6e (128 MiB physical),
# ~48 MiB on v7x (64 MiB physical), conservative fallback otherwise.
# ---------------------------------------------------------------------------
def _vmem_limit_bytes():
    cap = None
    try:
        cap = int(pltpu.get_tpu_info().vmem_capacity_bytes)
    except Exception:
        cap = None
    if not cap or cap <= 32 * 1024 * 1024:
        return 32 * 1024 * 1024
    return int(min(cap - 16 * 1024 * 1024, 100 * 1024 * 1024))


# ---------------------------------------------------------------------------
# Wrapper: single pallas_call with a 1-D "parallel" grid over graph blocks.
# Weights use a constant index_map (same block every step -> resident in VMEM);
# per-block node/edge/graph data is auto-pipelined by BlockSpec.
# ---------------------------------------------------------------------------
def gin_forward(packed, x_blk, ea_blk, src_blk, dstT_blk, batT_blk,
                graphs_per_block, out_pad):
    nb, n_b, x_dim = x_blk.shape
    e_b, ea_dim = ea_blk.shape[1], ea_blk.shape[2]
    hid = packed["node_w"].shape[1]
    n_layers = packed["w1"].shape[0]

    def blk(shape):   # one block per grid step, leading (block) dim squeezed
        return pl.BlockSpec((None,) + shape, lambda b: (b,) + (0,) * len(shape))

    def rep(shape):   # replicated across the grid (weights / biases)
        return pl.BlockSpec(shape, lambda b: (0,) * len(shape))

    grid_spec = pltpu.PrefetchScalarGridSpec(
        num_scalar_prefetch=0,
        grid=(nb,),
        in_specs=[
            blk((n_b, x_dim)), blk((e_b, ea_dim)),
            blk((e_b, 1)), blk((1, e_b)), blk((1, n_b)),
            rep((x_dim, hid)), rep((1, hid)),
            rep((ea_dim, hid)), rep((1, hid)),
            rep((n_layers, hid, hid)), rep((n_layers, 1, hid)),
            rep((n_layers, hid, hid)), rep((n_layers, 1, hid)),
            rep((hid, out_pad)), rep((1, out_pad)),
        ],
        out_specs=blk((graphs_per_block, out_pad)),
    )
    return pl.pallas_call(
        _gin_fused_kernel,
        out_shape=jax.ShapeDtypeStruct((nb, graphs_per_block, out_pad), jnp.float32),
        grid_spec=grid_spec,
        compiler_params=pltpu.CompilerParams(
            dimension_semantics=("parallel",),
            vmem_limit_bytes=_vmem_limit_bytes(),
        ),
    )(
        x_blk, ea_blk, src_blk, dstT_blk, batT_blk,
        packed["node_w"], packed["node_b"], packed["edge_w"], packed["edge_b"],
        packed["w1"], packed["b1"], packed["w2"], packed["b2"],
        packed["out_w"], packed["out_b"],
    )


# ---------------------------------------------------------------------------
# Parameter preparation: fold eval-mode BatchNorm into the first MLP Linear,
# zero-pad hidden to a lane-dense 128 and the output dim to `out_pad`, cast the
# MXU-side weight matrices to bf16 (biases stay f32; math stays exact in the
# padded lanes since they are identically zero).
# ---------------------------------------------------------------------------
def fold_and_pad_params(params, hidden_pad, out_pad):
    def pad(a, axis, to):
        cur = a.shape[axis]
        if cur >= to:
            return a
        pads = [(0, 0)] * a.ndim
        pads[axis] = (0, to - cur)
        return jnp.pad(a, pads)

    bf16 = jnp.bfloat16
    node_w = pad(params["node_w"], 1, hidden_pad).astype(bf16)
    node_b = pad(params["node_b"], 1, hidden_pad)
    edge_w = pad(params["edge_w"], 1, hidden_pad).astype(bf16)
    edge_b = pad(params["edge_b"], 1, hidden_pad)
    out_w = pad(pad(params["out_w"], 0, hidden_pad), 1, out_pad).astype(bf16)
    out_b = pad(params["out_b"], 1, out_pad)

    w1s, b1s, w2s, b2s = [], [], [], []
    for (w1, b1, gamma, beta, mu, var, w2, b2) in params["layers"]:
        s = gamma * jax.lax.rsqrt(var + BN_EPS)          # (1, hidden)
        w1f = w1 * s                                     # scale output columns
        b1f = (b1 - mu) * s + beta
        w1s.append(pad(pad(w1f, 0, hidden_pad), 1, hidden_pad).astype(bf16))
        b1s.append(pad(b1f, 1, hidden_pad))
        w2s.append(pad(pad(w2, 0, hidden_pad), 1, hidden_pad).astype(bf16))
        b2s.append(pad(b2, 1, hidden_pad))

    return {
        "node_w": node_w, "node_b": node_b,
        "edge_w": edge_w, "edge_b": edge_b,
        "out_w": out_w, "out_b": out_b,
        "w1": jnp.stack(w1s), "b1": jnp.stack(b1s),
        "w2": jnp.stack(w2s), "b2": jnp.stack(b2s),
    }


# ---------------------------------------------------------------------------
# Deterministic raw (unfolded, f32) parameter construction
# ---------------------------------------------------------------------------
def make_params(key, x_dim, edge_attr_dim, hidden, n_layers, out_dim):
    def lin(k, din, dout, scale=0.1):
        kw, kb = jax.random.split(k)
        w = jax.random.normal(kw, (din, dout), jnp.float32) * scale
        b = jax.random.normal(kb, (1, dout), jnp.float32) * scale
        return w, b

    keys = jax.random.split(key, 3 + 2 * n_layers)
    node_w, node_b = lin(keys[0], x_dim, hidden)
    edge_w, edge_b = lin(keys[1], edge_attr_dim, hidden)
    out_w, out_b = lin(keys[2], hidden, out_dim)

    layers = []
    for i in range(n_layers):
        w1, b1 = lin(keys[3 + 2 * i], hidden, hidden)
        w2, b2 = lin(keys[4 + 2 * i], hidden, hidden)
        gamma = jnp.ones((1, hidden), jnp.float32)
        beta = jnp.zeros((1, hidden), jnp.float32)
        mu = jnp.zeros((1, hidden), jnp.float32)      # BN running mean (init)
        var = jnp.ones((1, hidden), jnp.float32)      # BN running var (init)
        layers.append((w1, b1, gamma, beta, mu, var, w2, b2))

    return {
        "node_w": node_w, "node_b": node_b,
        "edge_w": edge_w, "edge_b": edge_b,
        "out_w": out_w, "out_b": out_b,
        "layers": layers,
    }


# ---------------------------------------------------------------------------
# Plain-JAX f32 reference (mirrors the PyTorch module, eval mode)
# ---------------------------------------------------------------------------
def gin_reference(params, x, edge_index, batch, edge_attr, num_graphs):
    h = x @ params["node_w"] + params["node_b"]
    ea = edge_attr @ params["edge_w"] + params["edge_b"]
    src, dst = edge_index[0], edge_index[1]
    for (w1, b1, gamma, beta, mu, var, w2, b2) in params["layers"]:
        msg = jnp.maximum(h[src] + ea, 0.0)
        agg = jax.ops.segment_sum(msg, dst, num_segments=h.shape[0])
        hh = (1.0 + GIN_EPS) * h + agg
        h1 = (hh @ w1 + b1 - mu) * jax.lax.rsqrt(var + BN_EPS) * gamma + beta
        h1 = jnp.maximum(h1, 0.0)
        h = jnp.maximum(h1 @ w2 + b2, 0.0)
    pooled = jax.ops.segment_sum(h, batch, num_segments=num_graphs)
    return pooled @ params["out_w"] + params["out_b"]


if __name__ == "__main__":
    # model_config: n_layers=2, hidden_size=32, dropout_p (eval -> identity),
    # use_edge_attr=True, Linear encoders, num_class=2, multi_label=False -> out_dim=1
    X_DIM, EA_DIM, HIDDEN, N_LAYERS, OUT_DIM = 8, 4, 32, 2, 1
    HIDDEN_PAD = max(LANE, ((HIDDEN + LANE - 1) // LANE) * LANE)
    OUT_PAD = LANE   # lane-dense output store; sliced back to OUT_DIM below

    # Graph batch packed into NB independent blocks so the "parallel" grid can
    # spread work across TensorCores and the MXU sees full-height row tiles.
    NB, N_B, E_B, G_B = 2, 128, 256, 4      # 2 blocks x 128 nodes x 256 edges x 4 graphs
    NODES_PER_GRAPH = N_B // G_B
    EDGES_PER_GRAPH = E_B // G_B

    key = jax.random.PRNGKey(0)
    k_x, k_ea, k_s, k_d, k_p = jax.random.split(key, 5)

    x_blk = jax.random.normal(k_x, (NB, N_B, X_DIM), jnp.float32)
    ea_blk = jax.random.normal(k_ea, (NB, E_B, EA_DIM), jnp.float32)

    # Local (per-block) graph structure: edges stay inside their graph.
    graph_of_edge = jnp.repeat(jnp.arange(G_B, dtype=jnp.int32), EDGES_PER_GRAPH)
    src_loc = (jax.random.randint(k_s, (NB, E_B), 0, NODES_PER_GRAPH, jnp.int32)
               + graph_of_edge * NODES_PER_GRAPH)
    dst_loc = (jax.random.randint(k_d, (NB, E_B), 0, NODES_PER_GRAPH, jnp.int32)
               + graph_of_edge * NODES_PER_GRAPH)
    bat_loc = jnp.broadcast_to(
        jnp.repeat(jnp.arange(G_B, dtype=jnp.int32), NODES_PER_GRAPH), (NB, N_B))

    params = make_params(k_p, X_DIM, EA_DIM, HIDDEN, N_LAYERS, OUT_DIM)
    packed = fold_and_pad_params(params, HIDDEN_PAD, OUT_PAD)

    out_blk = gin_forward(
        packed, x_blk, ea_blk,
        src_loc.reshape(NB, E_B, 1),
        dst_loc.reshape(NB, 1, E_B),
        bat_loc.reshape(NB, 1, N_B),
        G_B, OUT_PAD)
    out_blk = jax.block_until_ready(out_blk)
    out = out_blk[..., :OUT_DIM].reshape(NB * G_B, OUT_DIM)

    # Plain-JAX f32 reference on the equivalent flat (global-index) batch.
    x_g = x_blk.reshape(NB * N_B, X_DIM)
    ea_g = ea_blk.reshape(NB * E_B, EA_DIM)
    offs_n = (jnp.arange(NB, dtype=jnp.int32) * N_B)[:, None]
    offs_g = (jnp.arange(NB, dtype=jnp.int32) * G_B)[:, None]
    edge_index_g = jnp.stack([(src_loc + offs_n).reshape(-1),
                              (dst_loc + offs_n).reshape(-1)])
    batch_g = (bat_loc + offs_g).reshape(-1)
    ref = gin_reference(params, x_g, edge_index_g, batch_g, ea_g, NB * G_B)

    assert out.shape == (NB * G_B, OUT_DIM), out.shape
    assert bool(jnp.all(jnp.isfinite(out)))
    assert bool(jnp.allclose(out, ref, rtol=5e-2, atol=5e-2)), (out, ref)
    print("KERNEL_OK")
</pallas_src>

<mosaic_0001>
module attributes {stable_mosaic.version = 11 : i64} {
  func.func @_gin_fused_kernel(%arg0: i32, %arg1: memref<1x128x8xf32, #tpu.memory_space<vmem>>, %arg2: memref<1x256x4xf32, #tpu.memory_space<vmem>>, %arg3: memref<1x256x1xi32, #tpu.memory_space<vmem>>, %arg4: memref<1x1x256xi32, #tpu.memory_space<vmem>>, %arg5: memref<1x1x128xi32, #tpu.memory_space<vmem>>, %arg6: memref<8x128xbf16, #tpu.memory_space<vmem>>, %arg7: memref<1x128xf32, #tpu.memory_space<vmem>>, %arg8: memref<4x128xbf16, #tpu.memory_space<vmem>>, %arg9: memref<1x128xf32, #tpu.memory_space<vmem>>, %arg10: memref<2x128x128xbf16, #tpu.memory_space<vmem>>, %arg11: memref<2x1x128xf32, #tpu.memory_space<vmem>>, %arg12: memref<2x128x128xbf16, #tpu.memory_space<vmem>>, %arg13: memref<2x1x128xf32, #tpu.memory_space<vmem>>, %arg14: memref<128x128xbf16, #tpu.memory_space<vmem>>, %arg15: memref<1x128xf32, #tpu.memory_space<vmem>>, %arg16: memref<1x4x128xf32, #tpu.memory_space<vmem>>) attributes {dimension_semantics = [#tpu.dimension_semantics<parallel>], iteration_bounds = array<i64: 2>, scalar_prefetch = 0 : i64, scratch_operands = 0 : i64, tpu.core_type = #tpu.core_type<tc>, window_params = [{transform_indices = @transform_0, window_bounds = array<i64: 1, 128, 8>}, {transform_indices = @transform_1, window_bounds = array<i64: 1, 256, 4>}, {transform_indices = @transform_2, window_bounds = array<i64: 1, 256, 1>}, {transform_indices = @transform_3, window_bounds = array<i64: 1, 1, 256>}, {transform_indices = @transform_4, window_bounds = array<i64: 1, 1, 128>}, {pipeline_mode = #tpu.pipeline_mode<synchronous>, transform_indices = @transform_5, window_bounds = array<i64: 8, 128>}, {pipeline_mode = #tpu.pipeline_mode<synchronous>, transform_indices = @transform_6, window_bounds = array<i64: 1, 128>}, {pipeline_mode = #tpu.pipeline_mode<synchronous>, transform_indices = @transform_7, window_bounds = array<i64: 4, 128>}, {pipeline_mode = #tpu.pipeline_mode<synchronous>, transform_indices = @transform_8, window_bounds = array<i64: 1, 128>}, {pipeline_mode = #tpu.pipeline_mode<synchronous>, transform_indices = @transform_9, window_bounds = array<i64: 2, 128, 128>}, {pipeline_mode = #tpu.pipeline_mode<synchronous>, transform_indices = @transform_10, window_bounds = array<i64: 2, 1, 128>}, {pipeline_mode = #tpu.pipeline_mode<synchronous>, transform_indices = @transform_11, window_bounds = array<i64: 2, 128, 128>}, {pipeline_mode = #tpu.pipeline_mode<synchronous>, transform_indices = @transform_12, window_bounds = array<i64: 2, 1, 128>}, {pipeline_mode = #tpu.pipeline_mode<synchronous>, transform_indices = @transform_13, window_bounds = array<i64: 128, 128>}, {pipeline_mode = #tpu.pipeline_mode<synchronous>, transform_indices = @transform_14, window_bounds = array<i64: 1, 128>}, {transform_indices = @transform_15, window_bounds = array<i64: 1, 4, 128>}]} {
    %0 = tpu.iota {dimensions = array<i32: 1>} : vector<256x128xi32>
    %c0 = arith.constant 0 : index
    %c0_0 = arith.constant 0 : index
    %c0_1 = arith.constant 0 : index
    %1 = vector.load %arg3[%c0, %c0_0, %c0_1] : memref<1x256x1xi32, #tpu.memory_space<vmem>>, vector<1x256x1xi32>
    %2 = vector.shape_cast %1 : vector<1x256x1xi32> to vector<256x1xi32>
    %3 = vector.broadcast %2 : vector<256x1xi32> to vector<256x128xi32>
    %4 = arith.cmpi eq, %0, %3 : vector<256x128xi32>
    %cst = arith.constant 1.000000e+00 : f32
    %cst_2 = arith.constant 0.000000e+00 : f32
    %5 = vector.broadcast %cst : f32 to vector<256x128xf32>
    %6 = vector.broadcast %cst_2 : f32 to vector<256x128xf32>
    %7 = arith.select %4, %5, %6 : vector<256x128xi1>, vector<256x128xf32>
    %8 = arith.truncf %7 : vector<256x128xf32> to vector<256x128xbf16>
    %9 = tpu.iota {dimensions = array<i32: 0>} : vector<128x256xi32>
    %c0_3 = arith.constant 0 : index
    %c0_4 = arith.constant 0 : index
    %c0_5 = arith.constant 0 : index
    %10 = vector.load %arg4[%c0_3, %c0_4, %c0_5] : memref<1x1x256xi32, #tpu.memory_space<vmem>>, vector<1x1x256xi32>
    %11 = vector.shape_cast %10 : vector<1x1x256xi32> to vector<1x256xi32>
    %12 = vector.broadcast %11 : vector<1x256xi32> to vector<128x256xi32>
    %13 = arith.cmpi eq, %9, %12 : vector<128x256xi32>
    %cst_6 = arith.constant 1.000000e+00 : f32
    %cst_7 = arith.constant 0.000000e+00 : f32
    %14 = vector.broadcast %cst_6 : f32 to vector<128x256xf32>
    %15 = vector.broadcast %cst_7 : f32 to vector<128x256xf32>
    %16 = arith.select %13, %14, %15 : vector<128x256xi1>, vector<128x256xf32>
    %17 = arith.truncf %16 : vector<128x256xf32> to vector<128x256xbf16>
    %18 = tpu.iota {dimensions = array<i32: 0>} : vector<4x128xi32>
    %c0_8 = arith.constant 0 : index
    %c0_9 = arith.constant 0 : index
    %c0_10 = arith.constant 0 : index
    %19 = vector.load %arg5[%c0_8, %c0_9, %c0_10] : memref<1x1x128xi32, #tpu.memory_space<vmem>>, vector<1x1x128xi32>
    %20 = vector.shape_cast %19 : vector<1x1x128xi32> to vector<1x128xi32>
    %21 = vector.broadcast %20 : vector<1x128xi32> to vector<4x128xi32>
    %22 = arith.cmpi eq, %18, %21 : vector<4x128xi32>
    %cst_11 = arith.constant 1.000000e+00 : f32
    %cst_12 = arith.constant 0.000000e+00 : f32
    %23 = vector.broadcast %cst_11 : f32 to vector<4x128xf32>
    %24 = vector.broadcast %cst_12 : f32 to vector<4x128xf32>
    %25 = arith.select %22, %23, %24 : vector<4x128xi1>, vector<4x128xf32>
    %26 = arith.truncf %25 : vector<4x128xf32> to vector<4x128xbf16>
    %c0_13 = arith.constant 0 : index
    %c0_14 = arith.constant 0 : index
    %c0_15 = arith.constant 0 : index
    %27 = vector.load %arg1[%c0_13, %c0_14, %c0_15] : memref<1x128x8xf32, #tpu.memory_space<vmem>>, vector<1x128x8xf32>
    %28 = vector.shape_cast %27 : vector<1x128x8xf32> to vector<128x8xf32>
    %29 = arith.truncf %28 : vector<128x8xf32> to vector<128x8xbf16>
    %c0_16 = arith.constant 0 : index
    %c0_17 = arith.constant 0 : index
    %30 = vector.load %arg6[%c0_16, %c0_17] : memref<8x128xbf16, #tpu.memory_space<vmem>>, vector<8x128xbf16>
    %cst_18 = arith.constant dense<0.000000e+00> : vector<128x128xf32>
    %31 = tpu.matmul %29, %30, %cst_18 {dimension_numbers = #tpu.dot_dimension_numbers<[1], [0], [0], [1], [0, 0, 1, 1], [], []>} : vector<128x8xbf16>, vector<8x128xbf16>, vector<128x128xf32> -> vector<128x128xf32>
    %c0_19 = arith.constant 0 : index
    %c0_20 = arith.constant 0 : index
    %32 = vector.load %arg7[%c0_19, %c0_20] : memref<1x128xf32, #tpu.memory_space<vmem>>, vector<1x128xf32>
    %33 = vector.broadcast %32 : vector<1x128xf32> to vector<128x128xf32>
    %34 = arith.addf %31, %33 : vector<128x128xf32>
    %c0_21 = arith.constant 0 : index
    %c0_22 = arith.constant 0 : index
    %c0_23 = arith.constant 0 : index
    %35 = vector.load %arg2[%c0_21, %c0_22, %c0_23] : memref<1x256x4xf32, #tpu.memory_space<vmem>>, vector<1x256x4xf32>
    %36 = vector.shape_cast %35 : vector<1x256x4xf32> to vector<256x4xf32>
    %37 = arith.truncf %36 : vector<256x4xf32> to vector<256x4xbf16>
    %c0_24 = arith.constant 0 : index
    %c0_25 = arith.constant 0 : index
    %38 = vector.load %arg8[%c0_24, %c0_25] : memref<4x128xbf16, #tpu.memory_space<vmem>>, vector<4x128xbf16>
    %cst_26 = arith.constant dense<0.000000e+00> : vector<256x128xf32>
    %39 = tpu.matmul %37, %38, %cst_26 {dimension_numbers = #tpu.dot_dimension_numbers<[1], [0], [0], [1], [0, 0, 1, 1], [], []>} : vector<256x4xbf16>, vector<4x128xbf16>, vector<256x128xf32> -> vector<256x128xf32>
    %c0_27 = arith.constant 0 : index
    %c0_28 = arith.constant 0 : index
    %40 = vector.load %arg9[%c0_27, %c0_28] : memref<1x128xf32, #tpu.memory_space<vmem>>, vector<1x128xf32>
    %41 = vector.broadcast %40 : vector<1x128xf32> to vector<256x128xf32>
    %42 = arith.addf %39, %41 : vector<256x128xf32>
    %43 = arith.truncf %34 : vector<128x128xf32> to vector<128x128xbf16>
    %cst_29 = arith.constant dense<0.000000e+00> : vector<256x128xf32>
    %44 = tpu.matmul %8, %43, %cst_29 {dimension_numbers = #tpu.dot_dimension_numbers<[1], [0], [0], [1], [0, 0, 1, 1], [], []>} : vector<256x128xbf16>, vector<128x128xbf16>, vector<256x128xf32> -> vector<256x128xf32>
    %45 = arith.addf %44, %42 : vector<256x128xf32>
    %cst_30 = arith.constant 0.000000e+00 : f32
    %46 = vector.broadcast %cst_30 : f32 to vector<256x128xf32>
    %47 = arith.maximumf %45, %46 : vector<256x128xf32>
    %48 = arith.truncf %47 : vector<256x128xf32> to vector<256x128xbf16>
    %cst_31 = arith.constant dense<0.000000e+00> : vector<128x128xf32>
    %49 = tpu.matmul %17, %48, %cst_31 {dimension_numbers = #tpu.dot_dimension_numbers<[1], [0], [0], [1], [0, 0, 1, 1], [], []>} : vector<128x256xbf16>, vector<256x128xbf16>, vector<128x128xf32> -> vector<128x128xf32>
    %cst_32 = arith.constant 1.000000e+00 : f32
    %50 = vector.broadcast %cst_32 : f32 to vector<128x128xf32>
    %51 = arith.mulf %50, %34 : vector<128x128xf32>
    %52 = arith.addf %51, %49 : vector<128x128xf32>
    %53 = arith.truncf %52 : vector<128x128xf32> to vector<128x128xbf16>
    %c0_33 = arith.constant 0 : index
    %c0_34 = arith.constant 0 : index
    %c0_35 = arith.constant 0 : index
    %54 = vector.load %arg10[%c0_33, %c0_34, %c0_35] : memref<2x128x128xbf16, #tpu.memory_space<vmem>>, vector<1x128x128xbf16>
    %55 = vector.shape_cast %54 : vector<1x128x128xbf16> to vector<128x128xbf16>
    %cst_36 = arith.constant dense<0.000000e+00> : vector<128x128xf32>
    %56 = tpu.matmul %53, %55, %cst_36 {dimension_numbers = #tpu.dot_dimension_numbers<[1], [0], [0], [1], [0, 0, 1, 1], [], []>} : vector<128x128xbf16>, vector<128x128xbf16>, vector<128x128xf32> -> vector<128x128xf32>
    %c0_37 = arith.constant 0 : index
    %c0_38 = arith.constant 0 : index
    %c0_39 = arith.constant 0 : index
    %57 = vector.load %arg11[%c0_37, %c0_38, %c0_39] : memref<2x1x128xf32, #tpu.memory_space<vmem>>, vector<1x1x128xf32>
    %58 = vector.shape_cast %57 : vector<1x1x128xf32> to vector<1x128xf32>
    %59 = vector.broadcast %58 : vector<1x128xf32> to vector<128x128xf32>
    %60 = arith.addf %56, %59 : vector<128x128xf32>
    %cst_40 = arith.constant 0.000000e+00 : f32
    %61 = vector.broadcast %cst_40 : f32 to vector<128x128xf32>
    %62 = arith.maximumf %60, %61 : vector<128x128xf32>
    %63 = arith.truncf %62 : vector<128x128xf32> to vector<128x128xbf16>
    %c0_41 = arith.constant 0 : index
    %c0_42 = arith.constant 0 : index
    %c0_43 = arith.constant 0 : index
    %64 = vector.load %arg12[%c0_41, %c0_42, %c0_43] : memref<2x128x128xbf16, #tpu.memory_space<vmem>>, vector<1x128x128xbf16>
    %65 = vector.shape_cast %64 : vector<1x128x128xbf16> to vector<128x128xbf16>
    %cst_44 = arith.constant dense<0.000000e+00> : vector<128x128xf32>
    %66 = tpu.matmul %63, %65, %cst_44 {dimension_numbers = #tpu.dot_dimension_numbers<[1], [0], [0], [1], [0, 0, 1, 1], [], []>} : vector<128x128xbf16>, vector<128x128xbf16>, vector<128x128xf32> -> vector<128x128xf32>
    %c0_45 = arith.constant 0 : index
    %c0_46 = arith.constant 0 : index
    %c0_47 = arith.constant 0 : index
    %67 = vector.load %arg13[%c0_45, %c0_46, %c0_47] : memref<2x1x128xf32, #tpu.memory_space<vmem>>, vector<1x1x128xf32>
    %68 = vector.shape_cast %67 : vector<1x1x128xf32> to vector<1x128xf32>
    %69 = vector.broadcast %68 : vector<1x128xf32> to vector<128x128xf32>
    %70 = arith.addf %66, %69 : vector<128x128xf32>
    %cst_48 = arith.constant 0.000000e+00 : f32
    %71 = vector.broadcast %cst_48 : f32 to vector<128x128xf32>
    %72 = arith.maximumf %70, %71 : vector<128x128xf32>
    %73 = arith.truncf %72 : vector<128x128xf32> to vector<128x128xbf16>
    %cst_49 = arith.constant dense<0.000000e+00> : vector<256x128xf32>
    %74 = tpu.matmul %8, %73, %cst_49 {dimension_numbers = #tpu.dot_dimension_numbers<[1], [0], [0], [1], [0, 0, 1, 1], [], []>} : vector<256x128xbf16>, vector<128x128xbf16>, vector<256x128xf32> -> vector<256x128xf32>
    %75 = arith.addf %74, %42 : vector<256x128xf32>
    %cst_50 = arith.constant 0.000000e+00 : f32
    %76 = vector.broadcast %cst_50 : f32 to vector<256x128xf32>
    %77 = arith.maximumf %75, %76 : vector<256x128xf32>
    %78 = arith.truncf %77 : vector<256x128xf32> to vector<256x128xbf16>
    %cst_51 = arith.constant dense<0.000000e+00> : vector<128x128xf32>
    %79 = tpu.matmul %17, %78, %cst_51 {dimension_numbers = #tpu.dot_dimension_numbers<[1], [0], [0], [1], [0, 0, 1, 1], [], []>} : vector<128x256xbf16>, vector<256x128xbf16>, vector<128x128xf32> -> vector<128x128xf32>
    %cst_52 = arith.constant 1.000000e+00 : f32
    %80 = vector.broadcast %cst_52 : f32 to vector<128x128xf32>
    %81 = arith.mulf %80, %72 : vector<128x128xf32>
    %82 = arith.addf %81, %79 : vector<128x128xf32>
    %83 = arith.truncf %82 : vector<128x128xf32> to vector<128x128xbf16>
    %c1 = arith.constant 1 : index
    %c0_53 = arith.constant 0 : index
    %c0_54 = arith.constant 0 : index
    %84 = vector.load %arg10[%c1, %c0_53, %c0_54] : memref<2x128x128xbf16, #tpu.memory_space<vmem>>, vector<1x128x128xbf16>
    %85 = vector.shape_cast %84 : vector<1x128x128xbf16> to vector<128x128xbf16>
    %cst_55 = arith.constant dense<0.000000e+00> : vector<128x128xf32>
    %86 = tpu.matmul %83, %85, %cst_55 {dimension_numbers = #tpu.dot_dimension_numbers<[1], [0], [0], [1], [0, 0, 1, 1], [], []>} : vector<128x128xbf16>, vector<128x128xbf16>, vector<128x128xf32> -> vector<128x128xf32>
    %c1_56 = arith.constant 1 : index
    %c0_57 = arith.constant 0 : index
    %c0_58 = arith.constant 0 : index
    %87 = vector.load %arg11[%c1_56, %c0_57, %c0_58] : memref<2x1x128xf32, #tpu.memory_space<vmem>>, vector<1x1x128xf32>
    %88 = vector.shape_cast %87 : vector<1x1x128xf32> to vector<1x128xf32>
    %89 = vector.broadcast %88 : vector<1x128xf32> to vector<128x128xf32>
    %90 = arith.addf %86, %89 : vector<128x128xf32>
    %cst_59 = arith.constant 0.000000e+00 : f32
    %91 = vector.broadcast %cst_59 : f32 to vector<128x128xf32>
    %92 = arith.maximumf %90, %91 : vector<128x128xf32>
    %93 = arith.truncf %92 : vector<128x128xf32> to vector<128x128xbf16>
    %c1_60 = arith.constant 1 : index
    %c0_61 = arith.constant 0 : index
    %c0_62 = arith.constant 0 : index
    %94 = vector.load %arg12[%c1_60, %c0_61, %c0_62] : memref<2x128x128xbf16, #tpu.memory_space<vmem>>, vector<1x128x128xbf16>
    %95 = vector.shape_cast %94 : vector<1x128x128xbf16> to vector<128x128xbf16>
    %cst_63 = arith.constant dense<0.000000e+00> : vector<128x128xf32>
    %96 = tpu.matmul %93, %95, %cst_63 {dimension_numbers = #tpu.dot_dimension_numbers<[1], [0], [0], [1], [0, 0, 1, 1], [], []>} : vector<128x128xbf16>, vector<128x128xbf16>, vector<128x128xf32> -> vector<128x128xf32>
    %c1_64 = arith.constant 1 : index
    %c0_65 = arith.constant 0 : index
    %c0_66 = arith.constant 0 : index
    %97 = vector.load %arg13[%c1_64, %c0_65, %c0_66] : memref<2x1x128xf32, #tpu.memory_space<vmem>>, vector<1x1x128xf32>
    %98 = vector.shape_cast %97 : vector<1x1x128xf32> to vector<1x128xf32>
    %99 = vector.broadcast %98 : vector<1x128xf32> to vector<128x128xf32>
    %100 = arith.addf %96, %99 : vector<128x128xf32>
    %cst_67 = arith.constant 0.000000e+00 : f32
    %101 = vector.broadcast %cst_67 : f32 to vector<128x128xf32>
    %102 = arith.maximumf %100, %101 : vector<128x128xf32>
    %103 = arith.truncf %102 : vector<128x128xf32> to vector<128x128xbf16>
    %cst_68 = arith.constant dense<0.000000e+00> : vector<4x128xf32>
    %104 = tpu.matmul %26, %103, %cst_68 {dimension_numbers = #tpu.dot_dimension_numbers<[1], [0], [0], [1], [0, 0, 1, 1], [], []>} : vector<4x128xbf16>, vector<128x128xbf16>, vector<4x128xf32> -> vector<4x128xf32>
    %105 = arith.truncf %104 : vector<4x128xf32> to vector<4x128xbf16>
    %c0_69 = arith.constant 0 : index
    %c0_70 = arith.constant 0 : index
    %106 = vector.load %arg14[%c0_69, %c0_70] : memref<128x128xbf16, #tpu.memory_space<vmem>>, vector<128x128xbf16>
    %cst_71 = arith.constant dense<0.000000e+00> : vector<4x128xf32>
    %107 = tpu.matmul %105, %106, %cst_71 {dimension_numbers = #tpu.dot_dimension_numbers<[1], [0], [0], [1], [0, 0, 1, 1], [], []>} : vector<4x128xbf16>, vector<128x128xbf16>, vector<4x128xf32> -> vector<4x128xf32>
    %c0_72 = arith.constant 0 : index
    %c0_73 = arith.constant 0 : index
    %108 = vector.load %arg15[%c0_72, %c0_73] : memref<1x128xf32, #tpu.memory_space<vmem>>, vector<1x128xf32>
    %109 = vector.broadcast %108 : vector<1x128xf32> to vector<4x128xf32>
    %110 = arith.addf %107, %109 : vector<4x128xf32>
    %c0_74 = arith.constant 0 : index
    %c0_75 = arith.constant 0 : index
    %c0_76 = arith.constant 0 : index
    %111 = vector.load %arg16[%c0_74, %c0_75, %c0_76] : memref<1x4x128xf32, #tpu.memory_space<vmem>>, vector<1x4x128xf32>
    %112 = vector.shape_cast %111 : vector<1x4x128xf32> to vector<4x128xf32>
    %113 = vector.shape_cast %110 : vector<4x128xf32> to vector<1x4x128xf32>
    tpu.vector_store %arg16[%c0_74, %c0_75, %c0_76], %113 {strides = array<i32>} : memref<1x4x128xf32, #tpu.memory_space<vmem>>, vector<1x4x128xf32>,
    return
  }
  func.func @transform_0(%arg0: i32) -> (i32, i32, i32) {
    %c0_i32 = arith.constant 0 : i32
    %c0_i32_0 = arith.constant 0 : i32
    %c0_i32_1 = arith.constant 0 : i32
    return %arg0, %c0_i32, %c0_i32_0 : i32, i32, i32
  }
  func.func @transform_1(%arg0: i32) -> (i32, i32, i32) {
    %c0_i32 = arith.constant 0 : i32
    %c0_i32_0 = arith.constant 0 : i32
    %c0_i32_1 = arith.constant 0 : i32
    return %arg0, %c0_i32, %c0_i32_0 : i32, i32, i32
  }
  func.func @transform_2(%arg0: i32) -> (i32, i32, i32) {
    %c0_i32 = arith.constant 0 : i32
    %c0_i32_0 = arith.constant 0 : i32
    %c0_i32_1 = arith.constant 0 : i32
    return %arg0, %c0_i32, %c0_i32_0 : i32, i32, i32
  }
  func.func @transform_3(%arg0: i32) -> (i32, i32, i32) {
    %c0_i32 = arith.constant 0 : i32
    %c0_i32_0 = arith.constant 0 : i32
    %c0_i32_1 = arith.constant 0 : i32
    return %arg0, %c0_i32, %c0_i32_0 : i32, i32, i32
  }
  func.func @transform_4(%arg0: i32) -> (i32, i32, i32) {
    %c0_i32 = arith.constant 0 : i32
    %c0_i32_0 = arith.constant 0 : i32
    %c0_i32_1 = arith.constant 0 : i32
    return %arg0, %c0_i32, %c0_i32_0 : i32, i32, i32
  }
  func.func @transform_5(%arg0: i32) -> (i32, i32) {
    %c0_i32 = arith.constant 0 : i32
    %c0_i32_0 = arith.constant 0 : i32
    %c0_i32_1 = arith.constant 0 : i32
    return %c0_i32, %c0_i32_0 : i32, i32
  }
  func.func @transform_6(%arg0: i32) -> (i32, i32) {
    %c0_i32 = arith.constant 0 : i32
    %c0_i32_0 = arith.constant 0 : i32
    %c0_i32_1 = arith.constant 0 : i32
    return %c0_i32, %c0_i32_0 : i32, i32
  }
  func.func @transform_7(%arg0: i32) -> (i32, i32) {
    %c0_i32 = arith.constant 0 : i32
    %c0_i32_0 = arith.constant 0 : i32
    %c0_i32_1 = arith.constant 0 : i32
    return %c0_i32, %c0_i32_0 : i32, i32
  }
  func.func @transform_8(%arg0: i32) -> (i32, i32) {
    %c0_i32 = arith.constant 0 : i32
    %c0_i32_0 = arith.constant 0 : i32
    %c0_i32_1 = arith.constant 0 : i32
    return %c0_i32, %c0_i32_0 : i32, i32
  }
  func.func @transform_9(%arg0: i32) -> (i32, i32, i32) {
    %c0_i32 = arith.constant 0 : i32
    %c0_i32_0 = arith.constant 0 : i32
    %c0_i32_1 = arith.constant 0 : i32
    %c0_i32_2 = arith.constant 0 : i32
    return %c0_i32, %c0_i32_0, %c0_i32_1 : i32, i32, i32
  }
  func.func @transform_10(%arg0: i32) -> (i32, i32, i32) {
    %c0_i32 = arith.constant 0 : i32
    %c0_i32_0 = arith.constant 0 : i32
    %c0_i32_1 = arith.constant 0 : i32
    %c0_i32_2 = arith.constant 0 : i32
    return %c0_i32, %c0_i32_0, %c0_i32_1 : i32, i32, i32
  }
  func.func @transform_11(%arg0: i32) -> (i32, i32, i32) {
    %c0_i32 = arith.constant 0 : i32
    %c0_i32_0 = arith.constant 0 : i32
    %c0_i32_1 = arith.constant 0 : i32
    %c0_i32_2 = arith.constant 0 : i32
    return %c0_i32, %c0_i32_0, %c0_i32_1 : i32, i32, i32
  }
  func.func @transform_12(%arg0: i32) -> (i32, i32, i32) {
    %c0_i32 = arith.constant 0 : i32
    %c0_i32_0 = arith.constant 0 : i32
    %c0_i32_1 = arith.constant 0 : i32
    %c0_i32_2 = arith.constant 0 : i32
    return %c0_i32, %c0_i32_0, %c0_i32_1 : i32, i32, i32
  }
  func.func @transform_13(%arg0: i32) -> (i32, i32) {
    %c0_i32 = arith.constant 0 : i32
    %c0_i32_0 = arith.constant 0 : i32
    %c0_i32_1 = arith.constant 0 : i32
    return %c0_i32, %c0_i32_0 : i32, i32
  }
  func.func @transform_14(%arg0: i32) -> (i32, i32) {
    %c0_i32 = arith.constant 0 : i32
    %c0_i32_0 = arith.constant 0 : i32
    %c0_i32_1 = arith.constant 0 : i32
    return %c0_i32, %c0_i32_0 : i32, i32
  }
  func.func @transform_15(%arg0: i32) -> (i32, i32, i32) {
    %c0_i32 = arith.constant 0 : i32
    %c0_i32_0 = arith.constant 0 : i32
    %c0_i32_1 = arith.constant 0 : i32
    return %arg0, %c0_i32, %c0_i32_0 : i32, i32, i32
  }
}

</mosaic_0001>

<bundles_post_ra>
// kernel: tpu_custom_call.1
= control target key start
LH: loop header
LB: loop body
LE: loop exit
PB: predicated region body
PF: predicated region fallthrough
CT: control target
= control target key end

     0   :  { %s5404_s0 = inlined_call_operand.vmem [shape: f32[2,128,8], index: 0, kind: input, shape index: {}]   ;;  %s5405_s1 = inlined_call_operand.vmem [shape: f32[2,256,4], index: 1, kind: input, shape index: {}]   ;;  %s5406_s2 = inlined_call_operand.vmem [shape: s32[2,256,1], index: 2, kind: input, shape index: {}]   ;;  %s5407_s3 = inlined_call_operand.vmem [shape: s32[2,1,256], index: 3, kind: input, shape index: {}]   ;;  %s5408_s4 = inlined_call_operand.vmem [shape: s32[2,1,128], index: 4, kind: input, shape index: {}]   ;;  %s5409_s5 = inlined_call_operand.vmem [shape: bf16[8,128], index: 5, kind: input, shape index: {}]   ;;  %s5410_s6 = inlined_call_operand.vmem [shape: f32[1,128], index: 6, kind: input, shape index: {}]   ;;  %s5411_s7 = inlined_call_operand.vmem [shape: bf16[4,128], index: 7, kind: input, shape index: {}]   ;;  %s5412_s8 = inlined_call_operand.vmem [shape: f32[1,128], index: 8, kind: input, shape index: {}]   ;;  %s5413_s9 = inlined_call_operand.vmem [shape: bf16[2,128,128], index: 9, kind: input, shape index: {}]   ;;  %s5414_s10 = inlined_call_operand.vmem [shape: f32[2,1,128], index: 10, kind: input, shape index: {}]   ;;  %s5415_s11 = inlined_call_operand.vmem [shape: bf16[2,128,128], index: 11, kind: input, shape index: {}]   ;;  %s5416_s12 = inlined_call_operand.vmem [shape: f32[2,1,128], index: 12, kind: input, shape index: {}]   ;;  %s5417_s13 = inlined_call_operand.vmem [shape: bf16[128,128], index: 13, kind: input, shape index: {}]   ;;  %s5418_s14 = inlined_call_operand.vmem [shape: f32[1,128], index: 14, kind: input, shape index: {}]   ;;  %s5419_s15 = inlined_call_operand.hbm [shape: f32[2,4,128], index: 15, kind: output, shape index: {}]  }
   0x1   :  { %5500 = sst [smem:[#allocation42_spill]] %s5404_s0 }
   0x2   :  { %5501 = sst [smem:[#allocation43_spill]] %s5405_s1 }
   0x3   :  { %5502 = sst [smem:[#allocation44_spill]] %s5406_s2 }
   0x4   :  { %5503 = sst [smem:[#allocation45_spill]] %s5407_s3 }
   0x5   :  { %20 = vsyncpa [#allocation3], 0 }
   0x6   :  { %22 = vsyncpa [#allocation3 + $0x1], 0  ;;  %s4119_s18 = smov 0   ;;  %s4121_s19 = smov 0  }
   0x7   :  { %s4123_s20 = smov 0   ;;  %s4125_s21 = smov 0  }
   0x8 LB: > { %s4140_s22 = sadd.s32 4294967295, %s4032_s21   ;;  %s3028_s23 = sadd.s32 4294967294, %s4032_s21   ;;  %s4032_s21 = sphi %s4125_s21, %s5696_s21   ;;  %s4028_s20 = sphi %s4123_s20, %s5695_s20   ;;  %s4024_s19 = sphi %s4121_s19, %s5694_s19   ;;  %s4020_s18 = sphi %s4119_s18, %s5693_s18  }
   0x9   : > { %s4144_s24 = sadd.s32 1, %s4032_s21   ;;  %s375_s25 = sadd.s32 1, %s4028_s20 }
   0xa   : > { %s372_s26 = ssub.s32 %s4032_s21, %s4144_s24  ;;  %p385_p0 = scmp.ne.s32.totalorder %s4028_s20, %s4024_s19 }
   0xb   : > { %p373_p1 = scmp.eq.s32.totalorder %s372_s26, 0  ;;  %p386_p2 = scmp.eq.s32.totalorder %s4140_s22, 1 }
   0xc   : > { %p391_p3 = scmp.ne.s32.totalorder %s4024_s19, %s4020_s18  ;;  %p392_p4 = scmp.eq.s32.totalorder %s3028_s23, 1 }
   0xd   : > { %s4155_s27 = scalar_select %p373_p1, %s4028_s20, %s375_s25  }
   0xe   : > { %p4157_p5 = por %p386_p2, %p385_p0  ;;  %p4161_p6 = por %p392_p4, %p391_p3 }
   0xf   : > { %p3031_p7 = scmp.ge.s32.totalorder %s4032_s21, 1  ;;  %p477_p8 = scmp.lt.s32.totalorder %s4032_s21, 3 }
  0x11   : > { %p478_p9 = pnand %p3031_p7, %p477_p8 }
  0x13   : > { %481 = sbr.rel (%p478_p9) target bundleno = 2755 (0xac3), region = 80 }
  0x1a   : > { %v913_v0 = vld [vmem:[%s5409_s5] sm:$0xf]  ;;  %vm946_vm0 = vcmask 1043456   ;;  %p542_p10 = scmp.lt.s32.totalorder %s4140_s22, 1  ;;  %v4034_v2 = vmov 0   ;;  %s5506_s0 = sld [smem:[#allocation42_spill]] }
  0x1b   : > { %3883 = vmatprep.subr.msk.bf16.mxu0 %vm946_vm0, %v913_v0  ;;  %v948_v1 = vsel %vm946_vm0, %v913_v0, 0  ;;  %3929 = vset.pattern.permute.xlu1 %v4034_v2  ;;  %vm921_vm1 = vcmask 64512   ;;  %s5507_s2 = sld [smem:[#allocation44_spill]]  ;;  %s5508_s1 = sld [smem:[#allocation43_spill]]  ;;  %v1095_v59 = vld [vmem:[%s5411_s7] sm:$0x3] }
  0x1c   : > { %3568 = vmatpush3.bf16.msra.mxu0 %v948_v1  ;;  %s4172_s17 = scalar_select %p542_p10, %s4140_s22, 1  ;;  %3928 = vset.pattern.permute.xlu0 %v4034_v2  ;;  %vm1152_vm2 = vcmask 1041408   ;;  %vm1103_vm3 = vcmask 31744  }
  0x1d   : > { %3884 = vmatprep.subr.msk.bf16.mxu1 %vm1152_vm2, %v1095_v59  ;;  %v1154_v60 = vsel %vm1152_vm2, %v1095_v59, 0  ;;  %s5560_s3 = sld [smem:[#allocation45_spill]] }
  0x1e   : > { %s3280_s23 = sshll.u32 %s4172_s17, 7  ;;  %s3281_s25 = sshll.u32 %s4172_s17, 8  ;;  %3586 = vmatpush3.bf16.msra.mxu1 %v1154_v60 }
  0x20   : > { %s4179_s16 = scalar_lea.vmem %s5506_s0, %s3280_s23  ;;  %s3277_s0 = sshll.u32 %s4140_s22, 6 }
  0x21   : > { %v889_v3 = vld [vmem:[%s4179_s16] sm:$0xff]  ;;  %v890_v4 = vld [vmem:[%s4179_s16 + $0x8] sm:$0xff]  ;;  %v891_v5 = vld [vmem:[%s4179_s16 + $0x10] sm:$0xff]  ;;  %s4192_s30 = scalar_lea.vmem %s5507_s2, %s3281_s25  ;;  %s4249_s26 = scalar_lea.vmem %s5508_s1, %s3281_s25 }
  0x22   : > { %v905_v6 = vpack.c.bf16 %v890_v4, %v889_v3  ;;  %v892_v7 = vld [vmem:[%s4179_s16 + $0x18] sm:$0xff]  ;;  %v893_v8 = vld [vmem:[%s4179_s16 + $0x20] sm:$0xff]  ;;  %v894_v9 = vld [vmem:[%s4179_s16 + $0x28] sm:$0xff]  ;;  %s3039_s25 = sshll.u32 %s4172_s17, 1 }
  0x23   : > { %v906_v10 = vpack.c.bf16 %v892_v7, %v891_v5  ;;  %v907_v11 = vpack.c.bf16 %v894_v9, %v893_v8  ;;  %v895_v12 = vld [vmem:[%s4179_s16 + $0x30] sm:$0xff]  ;;  %v896_v13 = vld [vmem:[%s4179_s16 + $0x38] sm:$0xff]  ;;  %v897_v15 = vld [vmem:[%s4179_s16 + $0x40] sm:$0xff]  ;;  %v5426_v9 = vlaneseq  ;;  %s560_s23 = scalar_lea.vmem %s5560_s3, %s3039_s25  ;;  %s563_s25 = scalar_lea.vmem %s5408_s4, %s4172_s17 }
  0x24   : > { %3569 = vmatprep.mubr.msk.bf16.mxu0 %vm921_vm1, %v905_v6  ;;  %v569_v14 = vld [vmem:[%s4192_s30 + $0x10] sm:$0xff]  ;;  %v898_v16 = vld [vmem:[%s4179_s16 + $0x48] sm:$0xff]  ;;  %v567_v17 = vld [vmem:[%s4192_s30] sm:$0xff]  ;;  %v908_v19 = vpack.c.bf16 %v896_v13, %v895_v12  ;;  %s539_s17 = sand.u32 1, %s4024_s19   ;;  %s5362_s3 = scalar_lea.hbm %s5419_s15, %s3277_s0 }
  0x25   : > { %3570 = vmatmul.mubr.msk.bf16.vlgmr.msra.gmra.mrb[0].mxu0 %vm921_vm1, %v906_v10  ;;  %606 = vperm.xlu1 %3929, %v569_v14   ;;  %v570_v18 = vld [vmem:[%s4192_s30 + $0x18] sm:$0xff]  ;;  %v568_v20 = vld [vmem:[%s4192_s30 + $0x8] sm:$0xff]  ;;  %v909_v21 = vpack.c.bf16 %v898_v16, %v897_v15  ;;  %v571_v23 = vld [vmem:[%s4192_s30 + $0x20] sm:$0xff]  ;;  %v4267_v10 = vand.u32 127, %v5426_v9 }
  0x26   : > { %3573 = vmatprep.mubr.msk.bf16.mxu0 %vm921_vm1, %v907_v11  ;;  %600 = vperm.xlu0 %3928, %v567_v17   ;;  %v572_v22 = vld [vmem:[%s4192_s30 + $0x28] sm:$0xff]  ;;  %v899_v24 = vld [vmem:[%s4179_s16 + $0x50] sm:$0xff]  ;;  %v900_v25 = vld [vmem:[%s4179_s16 + $0x58] sm:$0xff] }
  0x27   : > { %v901_v26 = vld [vmem:[%s4179_s16 + $0x60] sm:$0xff]  ;;  %v902_v27 = vld [vmem:[%s4179_s16 + $0x68] sm:$0xff]  ;;  %v574_v28 = vld [vmem:[%s4192_s30 + $0x38] sm:$0xff]  ;;  %v910_v29 = vpack.c.bf16 %v900_v25, %v899_v24 }
  0x28   : > { %v573_v30 = vld [vmem:[%s4192_s30 + $0x30] sm:$0xff]  ;;  %v911_v31 = vpack.c.bf16 %v902_v27, %v901_v26  ;;  %v576_v32 = vld [vmem:[%s4192_s30 + $0x48] sm:$0xff]  ;;  %v575_v33 = vld [vmem:[%s4192_s30 + $0x40] sm:$0xff] }
  0x29   : > { %609 = vperm.xlu1 %3929, %v570_v18   ;;  %v903_v34 = vld [vmem:[%s4179_s16 + $0x70] sm:$0xff]  ;;  %v904_v35 = vld [vmem:[%s4179_s16 + $0x78] sm:$0xff]  ;;  %v580_v39 = vld [vmem:[%s4192_s30 + $0x68] sm:$0xff]  ;;  %s3032_s16 = sshll.u32 %s539_s17, 2 }
  0x2a   : > { %603 = vperm.xlu0 %3928, %v568_v20   ;;  %v578_v36 = vld [vmem:[%s4192_s30 + $0x58] sm:$0xff]  ;;  %v577_v37 = vld [vmem:[%s4192_s30 + $0x50] sm:$0xff]  ;;  %v912_v38 = vpack.c.bf16 %v904_v35, %v903_v34  ;;  %v579_v40 = vld [vmem:[%s4192_s30 + $0x60] sm:$0xff]  ;;  %v5424_v20 = vmov 1.0|1.0   ;;  %s541_s2 = scalar_lea.vmem [#allocation2], %s3032_s16 }
  0x2b   : > { %v582_v41 = vld [vmem:[%s4192_s30 + $0x78] sm:$0xff]  ;;  %v581_v42 = vld [vmem:[%s4192_s30 + $0x70] sm:$0xff]  ;;  %v584_v43 = vld [vmem:[%s4192_s30 + $0x88] sm:$0xff]  ;;  %s4038_s16 = smov [#allocation2]  }
  0x2c   : > { %v583_v44 = vld [vmem:[%s4192_s30 + $0x80] sm:$0xff]  ;;  %v586_v45 = vld [vmem:[%s4192_s30 + $0x98] sm:$0xff]  ;;  %v585_v46 = vld [vmem:[%s4192_s30 + $0x90] sm:$0xff] }
  0x2d   : > { %3574 = vmatmul.mubr.msk.bf16.gmra.mrb[4].mxu0 %vm921_vm1, %v908_v19  ;;  %615 = vperm.xlu1 %3929, %v572_v22   ;;  %v588_v47 = vld [vmem:[%s4192_s30 + $0xa8] sm:$0xff]  ;;  %v587_v48 = vld [vmem:[%s4192_s30 + $0xa0] sm:$0xff]  ;;  %v590_v49 = vld [vmem:[%s4192_s30 + $0xb8] sm:$0xff] }
  0x2e   : > { %3577 = vmatprep.mubr.msk.bf16.mxu0 %vm921_vm1, %v909_v21  ;;  %612 = vperm.xlu0 %3928, %v571_v23   ;;  %v589_v50 = vld [vmem:[%s4192_s30 + $0xb0] sm:$0xff]  ;;  %v592_v51 = vld [vmem:[%s4192_s30 + $0xc8] sm:$0xff]  ;;  %v591_v52 = vld [vmem:[%s4192_s30 + $0xc0] sm:$0xff] }
  0x2f   : > { %v594_v53 = vld [vmem:[%s4192_s30 + $0xd8] sm:$0xff]  ;;  %v593_v54 = vld [vmem:[%s4192_s30 + $0xd0] sm:$0xff]  ;;  %v596_v55 = vld [vmem:[%s4192_s30 + $0xe8] sm:$0xff] }
  0x30   : > { %v595_v56 = vld [vmem:[%s4192_s30 + $0xe0] sm:$0xff]  ;;  %v598_v57 = vld [vmem:[%s4192_s30 + $0xf8] sm:$0xff]  ;;  %v597_v58 = vld [vmem:[%s4192_s30 + $0xf0] sm:$0xff] }
  0x31   : > { %621 = vperm.xlu1 %3929, %v574_v28   ;;  %v1047_v61 = vld [vmem:[%s4249_s26] sm:$0xff]  ;;  %v1048_v62 = vld [vmem:[%s4249_s26 + $0x8] sm:$0xff]  ;;  %v1049_v0 = vld [vmem:[%s4249_s26 + $0x10] sm:$0xff] }
  0x32   : > { %618 = vperm.xlu0 %3928, %v573_v30   ;;  %v1079_v63 = vpack.c.bf16 %v1048_v62, %v1047_v61  ;;  %v1050_v1 = vld [vmem:[%s4249_s26 + $0x18] sm:$0xff]  ;;  %v1051_v3 = vld [vmem:[%s4249_s26 + $0x20] sm:$0xff]  ;;  %v1052_v4 = vld [vmem:[%s4249_s26 + $0x28] sm:$0xff] }
  0x33   : > { %v1080_v2 = vpack.c.bf16 %v1050_v1, %v1049_v0  ;;  %v1081_v5 = vpack.c.bf16 %v1052_v4, %v1051_v3  ;;  %v1053_v6 = vld [vmem:[%s4249_s26 + $0x30] sm:$0xff]  ;;  %v1054_v7 = vld [vmem:[%s4249_s26 + $0x38] sm:$0xff]  ;;  %v1055_v12 = vld [vmem:[%s4249_s26 + $0x40] sm:$0xff] }
  0x34   : > { %3587 = vmatprep.mubr.msk.bf16.mxu1 %vm1103_vm3, %v1079_v63  ;;  %v1082_v8 = vpack.c.bf16 %v1054_v7, %v1053_v6  ;;  %v1056_v13 = vld [vmem:[%s4249_s26 + $0x48] sm:$0xff]  ;;  %v1057_v15 = vld [vmem:[%s4249_s26 + $0x50] sm:$0xff]  ;;  %v1058_v16 = vld [vmem:[%s4249_s26 + $0x58] sm:$0xff] }
  0x35   : > { %3578 = vmatmul.mubr.msk.bf16.gmra.mrb[8].mxu0 %vm921_vm1, %v910_v29  ;;  %627 = vperm.xlu1 %3929, %v576_v32   ;;  %v1083_v14 = vpack.c.bf16 %v1056_v13, %v1055_v12  ;;  %v1084_v17 = vpack.c.bf16 %v1058_v16, %v1057_v15  ;;  %v1059_v21 = vld [vmem:[%s4249_s26 + $0x60] sm:$0xff]  ;;  %v1060_v22 = vld [vmem:[%s4249_s26 + $0x68] sm:$0xff]  ;;  %v1061_v24 = vld [vmem:[%s4249_s26 + $0x70] sm:$0xff] }
  0x36   : > { %3581 = vmatprep.mubr.msk.bf16.mxu0 %vm921_vm1, %v911_v31  ;;  %624 = vperm.xlu0 %3928, %v575_v33   ;;  %v1085_v23 = vpack.c.bf16 %v1060_v22, %v1059_v21  ;;  %v1062_v25 = vld [vmem:[%s4249_s26 + $0x78] sm:$0xff]  ;;  %v1063_v27 = vld [vmem:[%s4249_s26 + $0x80] sm:$0xff]  ;;  %v1064_v28 = vld [vmem:[%s4249_s26 + $0x88] sm:$0xff] }
  0x37   : > { %3588 = vmatmul.mubr.msk.bf16.vlgmr.msra.gmra.mrb[0].mxu1 %vm1103_vm3, %v1080_v2  ;;  %v1086_v26 = vpack.c.bf16 %v1062_v25, %v1061_v24  ;;  %v1087_v29 = vpack.c.bf16 %v1064_v28, %v1063_v27  ;;  %v1065_v30 = vld [vmem:[%s4249_s26 + $0x90] sm:$0xff]  ;;  %v1066_v31 = vld [vmem:[%s4249_s26 + $0x98] sm:$0xff]  ;;  %v1067_v33 = vld [vmem:[%s4249_s26 + $0xa0] sm:$0xff] }
  0x38   : > { %3591 = vmatprep.mubr.msk.bf16.mxu1 %vm1103_vm3, %v1081_v5  ;;  %v1088_v32 = vpack.c.bf16 %v1066_v31, %v1065_v30  ;;  %v1068_v34 = vld [vmem:[%s4249_s26 + $0xa8] sm:$0xff]  ;;  %v3937_v19 = vld [vmem:[%s5413_s9 + $0x38] sm:$0xff]  }
  0x39   : > { %633 = vperm.xlu1 %3929, %v578_v36   ;;  %v1089_v35 = vpack.c.bf16 %v1068_v34, %v1067_v33  ;;  %v1069_v36 = vld [vmem:[%s4249_s26 + $0xb0] sm:$0xff] }
  0x3a   : > { %630 = vperm.xlu0 %3928, %v577_v37   ;;  %v1070_v37 = vld [vmem:[%s4249_s26 + $0xb8] sm:$0xff] }
  0x3d   : > { %3582 = vmatmul.mubr.msk.bf16.gmra.mrb[12].mxu0 %vm921_vm1, %v912_v38  ;;  %639 = vperm.xlu1 %3929, %v580_v39   ;;  %v1090_v38 = vpack.c.bf16 %v1070_v37, %v1069_v36  ;;  %v1071_v39 = vld [vmem:[%s4249_s26 + $0xc0] sm:$0xff] }
  0x3e   : > { %636 = vperm.xlu0 %3928, %v579_v40   ;;  %v1072_v40 = vld [vmem:[%s4249_s26 + $0xc8] sm:$0xff] }
  0x3f   : > { %3592 = vmatmul.mubr.msk.bf16.gmra.mrb[4].mxu1 %vm1103_vm3, %v1082_v8 }
  0x40   : > { %3595 = vmatprep.mubr.msk.bf16.mxu1 %vm1103_vm3, %v1083_v14 }
  0x41   : > { %645 = vperm.xlu1 %3929, %v582_v41   ;;  %v1091_v41 = vpack.c.bf16 %v1072_v40, %v1071_v39 }
  0x42   : > { %642 = vperm.xlu0 %3928, %v581_v42   ;;  %v1073_v42 = vld [vmem:[%s4249_s26 + $0xd0] sm:$0xff] }
  0x45   : > { %651 = vperm.xlu1 %3929, %v584_v43   ;;  %v1074_v43 = vld [vmem:[%s4249_s26 + $0xd8] sm:$0xff] }
  0x46   : > { %648 = vperm.xlu0 %3928, %v583_v44   ;;  %v1092_v44 = vpack.c.bf16 %v1074_v43, %v1073_v42 }
  0x47   : > { %3596 = vmatmul.mubr.msk.bf16.gmra.mrb[8].mxu1 %vm1103_vm3, %v1084_v17 }
  0x48   : > { %3599 = vmatprep.mubr.msk.bf16.mxu1 %vm1103_vm3, %v1085_v23 }
  0x49   : > { %657 = vperm.xlu1 %3929, %v586_v45   ;;  %v1075_v45 = vld [vmem:[%s4249_s26 + $0xe0] sm:$0xff] }
  0x4a   : > { %654 = vperm.xlu0 %3928, %v585_v46   ;;  %v1076_v46 = vld [vmem:[%s4249_s26 + $0xe8] sm:$0xff] }
  0x4d   : > { %663 = vperm.xlu1 %3929, %v588_v47   ;;  %v1093_v47 = vpack.c.bf16 %v1076_v46, %v1075_v45  ;;  %v5516_v45 = vmov 0 }
  0x4e   : > { %660 = vperm.xlu0 %3928, %v587_v48   ;;  %v1077_v48 = vld [vmem:[%s4249_s26 + $0xf0] sm:$0xff] }
  0x4f   : > { %3600 = vmatmul.mubr.msk.bf16.gmra.mrb[12].mxu1 %vm1103_vm3, %v1086_v26 }
  0x50   : > { %3603 = vmatprep.mubr.msk.bf16.mxu1 %vm1103_vm3, %v1087_v29 }
  0x51   : > { %669 = vperm.xlu1 %3929, %v590_v49   ;;  %v1078_v49 = vld [vmem:[%s4249_s26 + $0xf8] sm:$0xff]  ;;  %s3974_s26 = sshll.u32 %s4038_s16, 4  ;;  %s3975_s26 = int_to_ptr.vmem [resolvable:$false] %s3974_s26 }
  0x52   : > { %666 = vperm.xlu0 %3928, %v589_v50   ;;  %v1094_v50 = vpack.c.bf16 %v1078_v49, %v1077_v48  ;;  %v5519_v48 = vmov 0  ;;  %s3976_s30 = scalar_lea.vmem %s3975_s26, 128 }
  0x55   : > { %675 = vperm.xlu1 %3929, %v592_v51  }
  0x56   : > { %672 = vperm.xlu0 %3928, %v591_v52  }
  0x57   : > { %3604 = vmatmul.mubr.msk.bf16.gmra.mrb[16].mxu1 %vm1103_vm3, %v1088_v32 }
  0x58   : > { %3607 = vmatprep.mubr.msk.bf16.mxu1 %vm1103_vm3, %v1089_v35 }
  0x59   : > { %681 = vperm.xlu1 %3929, %v594_v53   ;;  %v3041_v53 = vld [vmem:[%s5410_s6] ss:$0 sm:$0xff] }
  0x5a   : > { %678 = vperm.xlu0 %3928, %v593_v54  }
  0x5d   : > { %687 = vperm.xlu1 %3929, %v596_v55  }
  0x5e   : > { %684 = vperm.xlu0 %3928, %v595_v56  }
  0x5f   : > { %3608 = vmatmul.mubr.msk.bf16.gmra.mrb[20].mxu1 %vm1103_vm3, %v1090_v38 }
  0x60   : > { %3611 = vmatprep.mubr.msk.bf16.mxu1 %vm1103_vm3, %v1091_v41 }
  0x61   : > { %693 = vperm.xlu1 %3929, %v598_v57  }
  0x62   : > { %690 = vperm.xlu0 %3928, %v597_v58  }
  0x67   : > { %3612 = vmatmul.mubr.msk.bf16.gmra.mrb[24].mxu1 %vm1103_vm3, %v1092_v44  ;;  %v5513_v44 = vmov 0 }
  0x68   : > { %3615 = vmatprep.mubr.msk.bf16.mxu1 %vm1103_vm3, %v1093_v47 }
  0x6f   : > { %3616 = vmatmul.mubr.msk.bf16.gmra.mrb[28].mxu1 %vm1103_vm3, %v1094_v50 }
  0xa4   : > { %v4314_v51 = vpop.permute.xlu1 %606 }
  0xa5   : > { %v601_v11 = vpop.permute.xlu0 %600  ;;  %vm697_vm7 = vcmp.eq.s32.totalorder %v4267_v10, %v4314_v51  ;;  %v5522_v51 = vmov 0 }
  0xa6   : > { %vm695_vm4 = vcmp.eq.s32.totalorder %v4267_v10, %v601_v11 }
  0xa8   : > { %v4319_v57 = vpop.permute.xlu1 %609 }
  0xa9   : > { %v604_v18 = vpop.permute.xlu0 %603  ;;  %vm698_vm8 = vcmp.eq.s32.totalorder %v4267_v10, %v4319_v57 }
  0xaa   : > { %vm696_vm5 = vcmp.eq.s32.totalorder %v4267_v10, %v604_v18  ;;  %vm4375_vm11 = vmpackc.low %vm698_vm8, %vm697_vm7 }
  0xab   : > { %vm4277_vm6 = vmpackc.low %vm696_vm5, %vm695_vm4  ;;  %v5514_v44 = vsel %vm4375_vm11, 4294967295, %v5513_v44 }
  0xac   : > { %3635 = vmatprep.mubr.msk.bf16.mxu0 %vm4277_vm6, %v5424_v20  ;;  %v616_v2 = vpop.permute.xlu1 %615  ;;  %5515 = vst [vmem:[#allocation7_spill] sm:$0xff] %v5514_v44 }
  0xad   : > { %v613_v4 = vpop.permute.xlu0 %612  ;;  %vm700_vm9 = vcmp.eq.s32.totalorder %v4267_v10, %v616_v2  ;;  %v5537_v2 = vmov 0 }
  0xae   : > { %vm699_vm10 = vcmp.eq.s32.totalorder %v4267_v10, %v613_v4 }
  0xaf   : > { %vm4379_vm12 = vmpackc.low %vm700_vm9, %vm699_vm10 }
  0xb0   : > { %v622_v13 = vpop.permute.xlu1 %621  ;;  %v5517_v45 = vsel %vm4379_vm12, 4294967295, %v5516_v45 }
  0xb1   : > { %v619_v16 = vpop.permute.xlu0 %618  ;;  %5518 = vst [vmem:[#allocation8_spill] sm:$0xff] %v5517_v45  ;;  %vm702_vm13 = vcmp.eq.s32.totalorder %v4267_v10, %v622_v13 }
  0xb2   : > { %vm701_vm14 = vcmp.eq.s32.totalorder %v4267_v10, %v619_v16 }
  0xb3   : > { %vm4393_vm1 = vmpackc.low %vm702_vm13, %vm701_vm14 }
  0xb4   : > { %v628_v27 = vpop.permute.xlu1 %627  ;;  %v5520_v48 = vsel %vm4393_vm1, 4294967295, %v5519_v48 }
  0xb5   : > { %v625_v28 = vpop.permute.xlu0 %624  ;;  %vm704_vm15 = vcmp.eq.s32.totalorder %v4267_v10, %v628_v27  ;;  %5521 = vst [vmem:[#allocation9_spill] sm:$0xff] %v5520_v48 }
  0xb6   : > { %vm703_vm0 = vcmp.eq.s32.totalorder %v4267_v10, %v625_v28  ;;  %v5555_v28 = vmov 0 }
  0xb7   : > { %vm4397_vm2 = vmpackc.low %vm704_vm15, %vm703_vm0 }
  0xb8   : > { %v634_v37 = vpop.permute.xlu1 %633  ;;  %v5523_v51 = vsel %vm4397_vm2, 4294967295, %v5522_v51 }
  0xb9   : > { %v631_v38 = vpop.permute.xlu0 %630  ;;  %5524 = vst [vmem:[#allocation10_spill] sm:$0xff] %v5523_v51  ;;  %vm706_vm3 = vcmp.eq.s32.totalorder %v4267_v10, %v634_v37 }
  0xba   : > { %vm705_vm4 = vcmp.eq.s32.totalorder %v4267_v10, %v631_v38 }
  0xbb   : > { %vm4411_vm8 = vmpackc.low %vm706_vm3, %vm705_vm4 }
  0xbc   : > { %v640_v42 = vpop.permute.xlu1 %639 }
  0xbd   : > { %v637_v43 = vpop.permute.xlu0 %636  ;;  %vm708_vm5 = vcmp.eq.s32.totalorder %v4267_v10, %v640_v42 }
  0xbe   : > { %vm707_vm7 = vcmp.eq.s32.totalorder %v4267_v10, %v637_v43 }
  0xbf   : > { %vm4415_vm9 = vmpackc.low %vm708_vm5, %vm707_vm7 }
  0xc0   : > { %v646_v46 = vpop.permute.xlu1 %645 }
  0xc1   : > { %v643_v47 = vpop.permute.xlu0 %642  ;;  %vm710_vm10 = vcmp.eq.s32.totalorder %v4267_v10, %v646_v46 }
  0xc2   : > { %vm709_vm13 = vcmp.eq.s32.totalorder %v4267_v10, %v643_v47 }
  0xc3   : > { %vm4429_vm0 = vmpackc.low %vm710_vm10, %vm709_vm13 }
  0xc4   : > { %v652_v49 = vpop.permute.xlu1 %651 }
  0xc5   : > { %v649_v50 = vpop.permute.xlu0 %648  ;;  %vm712_vm14 = vcmp.eq.s32.totalorder %v4267_v10, %v652_v49 }
  0xc6   : > { %vm711_vm15 = vcmp.eq.s32.totalorder %v4267_v10, %v649_v50 }
  0xc7   : > { %vm4433_vm3 = vmpackc.low %vm712_vm14, %vm711_vm15 }
  0xf8   : > { %v3571_v52 = vpop.f32.mrb[0].mxu0 }
  0xf9   : > { %v984_v54 = vpop.f32.mrb[1].mxu0  ;;  %v4327_v61 = vadd.f32 %v3571_v52, %v3041_v53  ;;  %v658_v52 = vpop.permute.xlu1 %657 }
  0xfa   : > { %v3572_v55 = vpop.f32.mrb[2].mxu0  ;;  %v4321_v58 = vadd.f32 %v3041_v53, %v984_v54  ;;  %v5525_v54 = vmov 0  ;;  %vm714_vm4 = vcmp.eq.s32.totalorder %v4267_v10, %v658_v52 }
  0xfb   : > { %v987_v56 = vpop.f32.mrb[3].mxu0  ;;  %v4323_v59 = vadd.f32 %v3572_v55, %v3041_v53  ;;  %v5526_v54 = vsel %vm4411_vm8, 4294967295, %v5525_v54  ;;  %v5528_v55 = vmov 0 }
  0xfc   : > { %v4325_v60 = vadd.f32 %v3041_v53, %v987_v56  ;;  %5527 = vst [vmem:[#allocation11_spill] sm:$0xff] %v5526_v54  ;;  %v5529_v55 = vsel %vm4415_vm9, 4294967295, %v5528_v55 }
  0xfd   : > { %v1318_v63 = vpack.c.bf16 %v4323_v59, %v4327_v61  ;;  %5530 = vst [vmem:[#allocation12_spill] sm:$0xff] %v5529_v55  ;;  %v664_v56 = vpop.permute.xlu1 %663 }
  0xfe   : > { %v1317_v62 = vpack.c.bf16 %v4325_v60, %v4321_v58  ;;  %vm716_vm7 = vcmp.eq.s32.totalorder %v4267_v10, %v664_v56 }
 0x100   : > { %v3575_v0 = vpop.f32.mrb[4].mxu0  ;;  %3619 = vmatprep.subr.bf16.mxu0 %v1317_v62 }
 0x101   : > { %v1000_v1 = vpop.f32.mrb[5].mxu0  ;;  %3620 = vmatpush3.bf16.msra.mxu0 %v1317_v62  ;;  %v4339_v11 = vadd.f32 %v3575_v0, %v3041_v53  ;;  %v5531_v62 = vmov 0  ;;  %v670_v0 = vpop.permute.xlu1 %669 }
 0x102   : > { %v3576_v3 = vpop.f32.mrb[6].mxu0  ;;  %3621 = vmatprep.subr.bf16.mxu0 %v1318_v63  ;;  %v4333_v6 = vadd.f32 %v3041_v53, %v1000_v1  ;;  %v5532_v62 = vsel %vm4429_vm0, 4294967295, %v5531_v62  ;;  %vm718_vm15 = vcmp.eq.s32.totalorder %v4267_v10, %v670_v0 }
 0x103   : > { %v1003_v5 = vpop.f32.mrb[7].mxu0  ;;  %v4335_v7 = vadd.f32 %v3576_v3, %v3041_v53  ;;  %5533 = vst [vmem:[#allocation13_spill] sm:$0xff] %v5532_v62 }
 0x104   : > { %v4337_v8 = vadd.f32 %v3041_v53, %v1003_v5  ;;  %v5540_v5 = vmov 0 }
 0x105   : > { %3622 = vmatpush3.bf16.msra.mxu0 %v1318_v63  ;;  %v1320_v14 = vpack.c.bf16 %v4335_v7, %v4339_v11  ;;  %v5534_v63 = vmov 0  ;;  %v676_v3 = vpop.permute.xlu1 %675 }
 0x106   : > { %v1319_v12 = vpack.c.bf16 %v4337_v8, %v4333_v6  ;;  %v5535_v63 = vsel %vm4433_vm3, 4294967295, %v5534_v63 }
 0x107   : > { %5536 = vst [vmem:[#allocation14_spill] sm:$0xff] %v5535_v63 }
 0x108   : > { %v3579_v15 = vpop.f32.mrb[8].mxu0  ;;  %3623 = vmatprep.subr.bf16.mxu0 %v1319_v12 }
 0x109   : > { %v1016_v17 = vpop.f32.mrb[9].mxu0  ;;  %3624 = vmatpush3.bf16.msra.mxu0 %v1319_v12  ;;  %v4351_v25 = vadd.f32 %v3579_v15, %v3041_v53  ;;  %v682_v12 = vpop.permute.xlu1 %681  ;;  %v5546_v15 = vmov 0 }
 0x10a   : > { %v3580_v18 = vpop.f32.mrb[10].mxu0  ;;  %3625 = vmatprep.subr.bf16.mxu0 %v1320_v14  ;;  %v4345_v22 = vadd.f32 %v3041_v53, %v1016_v17 }
 0x10b   : > { %v1019_v21 = vpop.f32.mrb[11].mxu0  ;;  %v4347_v23 = vadd.f32 %v3580_v18, %v3041_v53  ;;  %v5549_v18 = vmov 0 }
 0x10c   : > { %v4349_v24 = vadd.f32 %v3041_v53, %v1019_v21  ;;  %v5552_v21 = vmov 0 }
 0x10d   : > { %3626 = vmatpush3.bf16.msra.mxu0 %v1320_v14  ;;  %v1322_v29 = vpack.c.bf16 %v4347_v23, %v4351_v25  ;;  %v5543_v14 = vmov 0  ;;  %v688_v16 = vpop.permute.xlu1 %687 }
 0x10e   : > { %v1321_v26 = vpack.c.bf16 %v4349_v24, %v4345_v22 }
 0x110   : > { %v3583_v30 = vpop.f32.mrb[12].mxu0  ;;  %3627 = vmatprep.subr.bf16.mxu0 %v1321_v26 }
 0x111   : > { %v1032_v31 = vpop.f32.mrb[13].mxu0  ;;  %3628 = vmatpush3.bf16.msra.mxu0 %v1321_v26  ;;  %v4363_v39 = vadd.f32 %v3583_v30, %v3041_v53  ;;  %v694_v26 = vpop.permute.xlu1 %693 }
 0x112   : > { %v3584_v32 = vpop.f32.mrb[14].mxu0  ;;  %3629 = vmatprep.subr.bf16.mxu0 %v1322_v29  ;;  %v4357_v34 = vadd.f32 %v3041_v53, %v1032_v31 }
 0x113   : > { %v1035_v33 = vpop.f32.mrb[15].mxu0  ;;  %v4359_v35 = vadd.f32 %v3584_v32, %v3041_v53  ;;  %5512 = vst [vmem:[#allocation6_spill] sm:$0xff] %v4363_v39 }
 0x114   : > { %v4361_v36 = vadd.f32 %v3041_v53, %v1035_v33  ;;  %v655_v53 = vpop.permute.xlu0 %654 }
 0x115   : > { %5511 = vst [vmem:[#allocation5_spill] sm:$0xff] %v4359_v35  ;;  %3630 = vmatpush3.bf16.msra.mxu0 %v1322_v29  ;;  %v1324_v41 = vpack.c.bf16 %v4359_v35, %v4363_v39  ;;  %vm713_vm5 = vcmp.eq.s32.totalorder %v4267_v10, %v655_v53  ;;  %v3589_v29 = vpop.f32.mrb[0].mxu1 }
 0x116   : > { %v1323_v40 = vpack.c.bf16 %v4361_v36, %v4357_v34  ;;  %vm4447_vm13 = vmpackc.low %vm714_vm4, %vm713_vm5  ;;  %vm720_vm5 = vcmp.eq.s32.totalorder %v4267_v10, %v676_v3  ;;  %v1190_v30 = vpop.f32.mrb[1].mxu1 }
 0x117   : > { %v5538_v2 = vsel %vm4447_vm13, 4294967295, %v5537_v2  ;;  %v3590_v31 = vpop.f32.mrb[2].mxu1 }
 0x118   : > { %3631 = vmatprep.subr.bf16.mxu0 %v1323_v40  ;;  %v661_v57 = vpop.permute.xlu0 %660  ;;  %5539 = vst [vmem:[#allocation15_spill] sm:$0xff] %v5538_v2  ;;  %v1193_v32 = vpop.f32.mrb[3].mxu1 }
 0x119   : > { %3632 = vmatpush3.bf16.msra.mxu0 %v1323_v40  ;;  %vm715_vm10 = vcmp.eq.s32.totalorder %v4267_v10, %v661_v57  ;;  %v3593_v33 = vpop.f32.mrb[4].mxu1 }
 0x11a   : > { %3633 = vmatprep.subr.bf16.mxu0 %v1324_v41  ;;  %vm4451_vm14 = vmpackc.low %vm716_vm7, %vm715_vm10  ;;  %v4506_v37 = vpop.f32.mrb[5].mxu1 }
 0x11b   : > { %v5541_v5 = vsel %vm4451_vm14, 4294967295, %v5540_v5  ;;  %v4508_v38 = vpop.f32.mrb[6].mxu1 }
 0x11c   : > { %v667_v1 = vpop.permute.xlu0 %666  ;;  %5542 = vst [vmem:[#allocation16_spill] sm:$0xff] %v5541_v5  ;;  %v4510_v40 = vpop.f32.mrb[7].mxu1 }
 0x11d   : > { %3634 = vmatpush3.bf16.msra.mxu0 %v1324_v41  ;;  %vm717_vm4 = vcmp.eq.s32.totalorder %v4267_v10, %v667_v1 }
 0x11e   : > { %vm4465_vm7 = vmpackc.low %vm718_vm15, %vm717_vm4  ;;  %vm724_vm4 = vcmp.eq.s32.totalorder %v4267_v10, %v688_v16 }
 0x11f   : > { %v5544_v14 = vsel %vm4465_vm7, 4294967295, %v5543_v14 }
 0x120   : > { %3636 = vmatmul.mubr.msk.bf16.vlgmr.msra.gmra.mrb[16].mxu0 %vm4375_vm11, %v5424_v20  ;;  %v673_v4 = vpop.permute.xlu0 %672  ;;  %5545 = vst [vmem:[#allocation17_spill] sm:$0xff] %v5544_v14  ;;  %v792_v14 = vld [vmem:[%s560_s23] sm:$0x3]  ;;  %s2911_s23 = scalar_lea.sflag [#allocation3], %s539_s17 }
 0x121   : > { %3639 = vmatprep.mubr.msk.bf16.mxu0 %vm4379_vm12, %v5424_v20 }
 0x124   : > { %v679_v13 = vpop.permute.xlu0 %678 }
 0x125   : > { %vm721_vm15 = vcmp.eq.s32.totalorder %v4267_v10, %v679_v13 }
 0x128   : > { %3640 = vmatmul.mubr.msk.bf16.gmra.mrb[20].mxu0 %vm4393_vm1, %v5424_v20  ;;  %v685_v17 = vpop.permute.xlu0 %684 }
 0x129   : > { %3643 = vmatprep.mubr.msk.bf16.mxu0 %vm4397_vm2, %v5424_v20 }
 0x12c   : > { %v691_v27 = vpop.permute.xlu0 %690 }
 0x130   : > { %3644 = vmatmul.mubr.msk.bf16.gmra.mrb[24].mxu0 %vm4411_vm8, %v5424_v20 }
 0x131   : > { %3647 = vmatprep.mubr.msk.bf16.mxu0 %vm4415_vm9, %v5424_v20 }
 0x138   : > { %3648 = vmatmul.mubr.msk.bf16.gmra.mrb[28].mxu0 %vm4429_vm0, %v5424_v20 }
 0x139   : > { %3651 = vmatprep.mubr.msk.bf16.mxu0 %vm4433_vm3, %v5424_v20  ;;  %vm719_vm3 = vcmp.eq.s32.totalorder %v4267_v10, %v673_v4 }
 0x13a   : > { %vm4469_vm10 = vmpackc.low %vm720_vm5, %vm719_vm3  ;;  %vm723_vm3 = vcmp.eq.s32.totalorder %v4267_v10, %v685_v17 }
 0x13b   : > { %v5547_v15 = vsel %vm4469_vm10, 4294967295, %v5546_v15 }
 0x13c   : > { %5548 = vst [vmem:[#allocation18_spill] sm:$0xff] %v5547_v15 }
 0x140   : > { %3652 = vmatmul.mubr.msk.bf16.gmra.mrb[32].mxu0 %vm4447_vm13, %v5424_v20  ;;  %vm4487_vm13 = vmpackc.low %vm724_vm4, %vm723_vm3 }
 0x141   : > { %3655 = vmatprep.mubr.msk.bf16.mxu0 %vm4451_vm14, %v5424_v20  ;;  %vm722_vm14 = vcmp.eq.s32.totalorder %v4267_v10, %v682_v12  ;;  %v5553_v21 = vsel %vm4487_vm13, 4294967295, %v5552_v21 }
 0x142   : > { %vm4483_vm5 = vmpackc.low %vm722_vm14, %vm721_vm15  ;;  %5554 = vst [vmem:[#allocation20_spill] sm:$0xff] %v5553_v21  ;;  %vm725_vm14 = vcmp.eq.s32.totalorder %v4267_v10, %v691_v27 }
 0x143   : > { %v5550_v18 = vsel %vm4483_vm5, 4294967295, %v5549_v18 }
 0x144   : > { %5551 = vst [vmem:[#allocation19_spill] sm:$0xff] %v5550_v18 }
 0x148   : > { %3656 = vmatmul.mubr.msk.bf16.gmra.mrb[36].mxu0 %vm4465_vm7, %v5424_v20 }
 0x149   : > { %3659 = vmatprep.mubr.msk.bf16.mxu0 %vm4469_vm10, %v5424_v20  ;;  %vm726_vm10 = vcmp.eq.s32.totalorder %v4267_v10, %v694_v26  ;;  %v4512_v10 = vpop.f32.mrb[8].mxu1 }
 0x14a   : > { %vm4499_vm15 = vmpackc.low %vm726_vm10, %vm725_vm14  ;;  %v4514_v41 = vpop.f32.mrb[9].mxu1 }
 0x14b   : > { %v5556_v28 = vsel %vm4499_vm15, 4294967295, %v5555_v28  ;;  %v4516_v42 = vpop.f32.mrb[10].mxu1 }
 0x14c   : > { %5557 = vst [vmem:[#allocation21_spill] sm:$0xff] %v5556_v28  ;;  %v4518_v43 = vpop.f32.mrb[11].mxu1  ;;  %v5558_v28 = vlaneseq }
 0x14d   : > { %v4520_v46 = vpop.f32.mrb[12].mxu1 }
 0x14e   : > { %v4522_v47 = vpop.f32.mrb[13].mxu1  ;;  %v4562_v21 = vshrl.u32 %v5558_v28, 7  ;;  %v5561_v28 = vmov 0 }
 0x14f   : > { %v4524_v49 = vpop.f32.mrb[14].mxu1 }
 0x150   : > { %3660 = vmatmul.mubr.msk.bf16.gmra.mrb[40].mxu0 %vm4483_vm5, %v5424_v20  ;;  %v4526_v50 = vpop.f32.mrb[15].mxu1  ;;  %5559 = vst [vmem:[#allocation22_spill] sm:$0xff] %v4562_v21  ;;  %v795_v18 = vsub.s32 0, %v4562_v21  ;;  %v799_v15 = vsub.s32 1, %v4562_v21  ;;  %v777_v63 = vadd.s32 8, %v4562_v21 }
 0x151   : > { %3663 = vmatprep.mubr.msk.bf16.mxu0 %vm4487_vm13, %v5424_v20  ;;  %v4528_v52 = vpop.f32.mrb[16].mxu1 }
 0x152   : > { %v4530_v53 = vpop.f32.mrb[17].mxu1  ;;  %v4569_v5 = vrot.slane %v792_v14, %v795_v18  ;;  %v4571_v2 = vrot.slane %v792_v14, %v799_v15  ;;  %v5564_v18 = vmov 1.0|1.0   ;;  %v5565_v14 = vmov 0  ;;  %v4594_v15 = vld [vmem:[%s5412_s8] ss:$0 sm:$0xff] }
 0x153   : > { %v4532_v56 = vpop.f32.mrb[18].mxu1  ;;  %v4600_v62 = vadd.f32 %v4594_v15, %v1190_v30  ;;  %v4603_v54 = vadd.f32 %v3590_v31, %v4594_v15  ;;  %v4607_v45 = vadd.f32 %v4594_v15, %v1193_v32  ;;  %v3930_v30 = vld [vmem:[%s5413_s9] sm:$0xff]   ;;  %v3931_v31 = vld [vmem:[%s5413_s9 + $0x8] sm:$0xff]   ;;  %v4619_v32 = vadd.f32 %v3593_v33, %v4594_v15 }
 0x154   : > { %v4534_v57 = vpop.f32.mrb[19].mxu1  ;;  %vm802_vm10 = vcmp.eq.s32.totalorder %v4562_v21, %v4571_v2  ;;  %vm803_vm4 = vcmp.eq.s32.totalorder %v777_v63, %v4569_v5  ;;  %vm804_vm3 = vcmp.eq.s32.totalorder %v777_v63, %v4571_v2  ;;  %vm801_vm14 = vcmp.eq.s32.totalorder %v4562_v21, %v4569_v5  ;;  %3667 = vmatprep.subr.bf16.mxu0 %v3930_v30 }
 0x155   : > { %v4536_v0 = vpop.f32.mrb[20].mxu1  ;;  %vm4587_vm13 = vmpackc.low %vm803_vm4, %vm801_vm14  ;;  %v4597_v63 = vadd.f32 %v3589_v29, %v4594_v15  ;;  %5568 = vst [vmem:[#allocation25_spill] sm:$0xff] %v4600_v62  ;;  %3668 = vmatpush3.bf16.msra.mxu0 %v3930_v30  ;;  %v4634_v33 = vadd.f32 %v4508_v38, %v4594_v15  ;;  %v3933_v38 = vld [vmem:[%s5413_s9 + $0x18] sm:$0xff]  }
 0x156   : > { %v4538_v1 = vpop.f32.mrb[21].mxu1  ;;  %v5566_v14 = vsel %vm4587_vm13, 4294967295, %v5565_v14  ;;  %5569 = vst [vmem:[#allocation26_spill] sm:$0xff] %v4603_v54  ;;  %5570 = vst [vmem:[#allocation27_spill] sm:$0xff] %v4607_v45  ;;  %3669 = vmatprep.subr.bf16.mxu0 %v3931_v31 }
 0x157   : > { %v4540_v3 = vpop.f32.mrb[22].mxu1  ;;  %5567 = vst [vmem:[#allocation24_spill] sm:$0xff] %v4597_v63  ;;  %5571 = vst [vmem:[#allocation28_spill] sm:$0xff] %v4619_v32 }
 0x158   : > { %3664 = vmatmul.mubr.msk.bf16.gmra.mrb[44].mxu0 %vm4499_vm15, %v5424_v20  ;;  %v4542_v4 = vpop.f32.mrb[23].mxu1  ;;  %vm4580_vm15 = vmpackc.low %vm804_vm3, %vm802_vm10  ;;  %5573 = vst [vmem:[#allocation30_spill] sm:$0xff] %v4634_v33 }
 0x159   : > { %v4544_v12 = vpop.f32.mrb[24].mxu1  ;;  %v5562_v28 = vsel %vm4580_vm15, 4294967295, %v5561_v28  ;;  %3100 = vmatprep.mubr.msk.bf16.mxu1 %vm4580_vm15, %v5564_v18  ;;  %3670 = vmatpush3.bf16.msra.mxu0 %v3931_v31  ;;  %v4653_v31 = vadd.f32 %v4594_v15, %v4514_v41 }
 0x15a   : > { %v4546_v13 = vpop.f32.mrb[25].mxu1  ;;  %5563 = vst [vmem:[#allocation23_spill] sm:$0xff] %v5562_v28 }
 0x15b   : > { %v4548_v16 = vpop.f32.mrb[26].mxu1 }
 0x15c   : > { %v4550_v17 = vpop.f32.mrb[27].mxu1 }
 0x15d   : > { %v4552_v26 = vpop.f32.mrb[28].mxu1 }
 0x15e   : > { %v4554_v27 = vpop.f32.mrb[29].mxu1 }
 0x15f   : > { %v4556_v20 = vpop.f32.mrb[30].mxu1 }
 0x160   : > { %v4558_v9 = vpop.f32.mrb[31].mxu1 }
 0x1f3   : > { %v3637_v55 = vpop.f32.mrb[16].mxu0 }
 0x1f4   : > { %v1368_v51 = vadd.f32 %v3637_v55, %v4597_v63  ;;  %v1359_v48 = vpop.f32.mrb[17].mxu0 }
 0x1f5   : > { %v1360_v44 = vadd.f32 %v1359_v48, %v4600_v62  ;;  %v3638_v28 = vpop.f32.mrb[18].mxu0 }
 0x1f6   : > { %v1371_v35 = vadd.f32 %v3638_v28, %v4603_v54  ;;  %v1362_v29 = vpop.f32.mrb[19].mxu0  ;;  %v1488_v63 = vmax.f32 %v1368_v51, 0.0  ;;  %v4623_v28 = vadd.f32 %v4594_v15, %v4506_v37  ;;  %v4639_v37 = vadd.f32 %v4594_v15, %v4510_v40 }
 0x1f7   : > { %v1363_v55 = vadd.f32 %v1362_v29, %v4607_v45  ;;  %v1486_v48 = vmax.f32 %v1360_v44, 0.0  ;;  %v3932_v29 = vld [vmem:[%s5413_s9 + $0x10] sm:$0xff]   ;;  %v4649_v40 = vadd.f32 %v4512_v10, %v4594_v15 }
 0x1f8   : > { %v1489_v39 = vmax.f32 %v1371_v35, 0.0  ;;  %5572 = vst [vmem:[#allocation29_spill] sm:$0xff] %v4623_v28  ;;  %3671 = vmatprep.subr.bf16.mxu0 %v3932_v29 }
 0x1f9   : > { %v1487_v62 = vmax.f32 %v1363_v55, 0.0  ;;  %3672 = vmatpush3.bf16.msra.mxu0 %v3932_v29 }
 0x1fa   : > { %v4625_v54 = vpack.c.bf16 %v1489_v39, %v1488_v63  ;;  %3673 = vmatprep.subr.bf16.mxu0 %v3933_v38 }
 0x1fb   : > { %v4630_v51 = vpack.c.bf16 %v1487_v62, %v1486_v48  ;;  %v3641_v35 = vpop.f32.mrb[20].mxu0 }
 0x1fc   : > { %v1384_v44 = vadd.f32 %v3641_v35, %v4619_v32  ;;  %v1375_v55 = vpop.f32.mrb[21].mxu0 }
 0x1fd   : > { %v1376_v39 = vadd.f32 %v1375_v55, %v4623_v28  ;;  %v3642_v63 = vpop.f32.mrb[22].mxu0  ;;  %3674 = vmatpush3.bf16.msra.mxu0 %v3933_v38 }
 0x1fe   : > { %v1387_v30 = vadd.f32 %v3642_v63, %v4634_v33  ;;  %v1378_v62 = vpop.f32.mrb[23].mxu0  ;;  %v1492_v35 = vmax.f32 %v1384_v44, 0.0  ;;  %v4661_v44 = vadd.f32 %v4516_v42, %v4594_v15  ;;  %v4673_v42 = vadd.f32 %v4520_v46, %v4594_v15 }
 0x1ff   : > { %v1379_v48 = vadd.f32 %v1378_v62, %v4639_v37  ;;  %v1490_v45 = vmax.f32 %v1376_v39, 0.0  ;;  %v4666_v39 = vadd.f32 %v4594_v15, %v4518_v43  ;;  %v4677_v43 = vadd.f32 %v4594_v15, %v4522_v47 }
 0x200   : > { %v1493_v32 = vmax.f32 %v1387_v30, 0.0  ;;  %5575 = vst [vmem:[#allocation32_spill] sm:$0xff] %v4673_v42  ;;  %v4690_v46 = vadd.f32 %v4594_v15, %v4526_v50  ;;  %v4701_v50 = vadd.f32 %v4594_v15, %v4530_v53 }
 0x201   : > { %v1491_v55 = vmax.f32 %v1379_v48, 0.0  ;;  %5574 = vst [vmem:[#allocation31_spill] sm:$0xff] %v4666_v39 }
 0x202   : > { %v4655_v63 = vpack.c.bf16 %v1493_v32, %v1492_v35  ;;  %5576 = vst [vmem:[#allocation33_spill] sm:$0xff] %v4690_v46  ;;  %5578 = vst [vmem:[#allocation35_spill] sm:$0xff] %v4701_v50 }
 0x203   : > { %v4657_v33 = vpack.c.bf16 %v1491_v55, %v1490_v45  ;;  %v3645_v28 = vpop.f32.mrb[24].mxu0 }
 0x204   : > { %v1400_v10 = vadd.f32 %v3645_v28, %v4649_v40  ;;  %v1391_v30 = vpop.f32.mrb[25].mxu0 }
 0x205   : > { %v1392_v41 = vadd.f32 %v1391_v30, %v4653_v31  ;;  %v3646_v29 = vpop.f32.mrb[26].mxu0 }
 0x206   : > { %v1403_v32 = vadd.f32 %v3646_v29, %v4661_v44  ;;  %v1394_v45 = vpop.f32.mrb[27].mxu0  ;;  %v1496_v48 = vmax.f32 %v1400_v10, 0.0 }
 0x207   : > { %v1395_v62 = vadd.f32 %v1394_v45, %v4666_v39  ;;  %v1494_v28 = vmax.f32 %v1392_v41, 0.0  ;;  %v4685_v45 = vadd.f32 %v4524_v49, %v4594_v15  ;;  %v4697_v49 = vadd.f32 %v4528_v52, %v4594_v15 }
 0x208   : > { %v1497_v35 = vmax.f32 %v1403_v32, 0.0  ;;  %v4714_v52 = vadd.f32 %v4594_v15, %v4534_v57  ;;  %v4725_v57 = vadd.f32 %v4594_v15, %v4538_v1 }
 0x209   : > { %v1495_v55 = vmax.f32 %v1395_v62, 0.0  ;;  %5577 = vst [vmem:[#allocation34_spill] sm:$0xff] %v4697_v49 }
 0x20a   : > { %v4679_v30 = vpack.c.bf16 %v1497_v35, %v1496_v48 }
 0x20b   : > { %v4681_v38 = vpack.c.bf16 %v1495_v55, %v1494_v28  ;;  %v3649_v29 = vpop.f32.mrb[28].mxu0 }
 0x20c   : > { %v1416_v10 = vadd.f32 %v3649_v29, %v4673_v42  ;;  %v1407_v32 = vpop.f32.mrb[29].mxu0 }
 0x20d   : > { %v1408_v41 = vadd.f32 %v1407_v32, %v4677_v43  ;;  %v3650_v47 = vpop.f32.mrb[30].mxu0 }
 0x20e   : > { %v1419_v62 = vadd.f32 %v3650_v47, %v4685_v45  ;;  %v1410_v48 = vpop.f32.mrb[31].mxu0  ;;  %v1500_v28 = vmax.f32 %v1416_v10, 0.0 }
 0x20f   : > { %v1411_v35 = vadd.f32 %v1410_v48, %v4690_v46  ;;  %v1498_v29 = vmax.f32 %v1408_v41, 0.0  ;;  %v4709_v48 = vadd.f32 %v4532_v56, %v4594_v15  ;;  %v4721_v56 = vadd.f32 %v4536_v0, %v4594_v15 }
 0x210   : > { %v1501_v55 = vmax.f32 %v1419_v62, 0.0  ;;  %v4734_v0 = vadd.f32 %v4594_v15, %v4542_v4 }
 0x211   : > { %v1499_v42 = vmax.f32 %v1411_v35, 0.0 }
 0x212   : > { %v4703_v39 = vpack.c.bf16 %v1501_v55, %v1500_v28 }
 0x213   : > { %v4705_v32 = vpack.c.bf16 %v1499_v42, %v1498_v29  ;;  %v3653_v47 = vpop.f32.mrb[32].mxu0 }
 0x214   : > { %v1432_v10 = vadd.f32 %v3653_v47, %v4697_v49  ;;  %v1423_v62 = vpop.f32.mrb[33].mxu0 }
 0x215   : > { %v1424_v41 = vadd.f32 %v1423_v62, %v4701_v50  ;;  %v3654_v53 = vpop.f32.mrb[34].mxu0 }
 0x216   : > { %v1435_v35 = vadd.f32 %v3654_v53, %v4709_v48  ;;  %v1426_v28 = vpop.f32.mrb[35].mxu0  ;;  %v1504_v55 = vmax.f32 %v1432_v10, 0.0  ;;  %v4729_v53 = vadd.f32 %v4540_v3, %v4594_v15 }
 0x217   : > { %v1427_v42 = vadd.f32 %v1426_v28, %v4714_v52  ;;  %v1502_v47 = vmax.f32 %v1424_v41, 0.0 }
 0x218   : > { %v1505_v29 = vmax.f32 %v1435_v35, 0.0 }
 0x219   : > { %v1503_v49 = vmax.f32 %v1427_v42, 0.0 }
 0x21a   : > { %v1527_v46 = vpack.c.bf16 %v1505_v29, %v1504_v55 }
 0x21b   : > { %v1526_v62 = vpack.c.bf16 %v1503_v49, %v1502_v47  ;;  %v3657_v50 = vpop.f32.mrb[36].mxu0  ;;  %v4746_v47 = vadd.f32 %v4594_v15, %v4546_v13 }
 0x21c   : > { %v1448_v10 = vadd.f32 %v3657_v50, %v4721_v56  ;;  %v1439_v35 = vpop.f32.mrb[37].mxu0  ;;  %v4742_v50 = vadd.f32 %v4544_v12, %v4594_v15  ;;  %v4756_v12 = vadd.f32 %v4594_v15, %v4550_v17 }
 0x21d   : > { %v1440_v41 = vadd.f32 %v1439_v35, %v4725_v57  ;;  %v3658_v28 = vpop.f32.mrb[38].mxu0  ;;  %3333 = vmatprep.subr.bf16.mxu1 %v1526_v62 }
 0x21e   : > { %v1451_v1 = vadd.f32 %v3658_v28, %v4729_v53  ;;  %v1442_v42 = vpop.f32.mrb[39].mxu0  ;;  %3334 = vmatpush3.bf16.msra.mxu1 %v4630_v51  ;;  %v1508_v3 = vmax.f32 %v1448_v10, 0.0 }
 0x21f   : > { %v1443_v49 = vadd.f32 %v1442_v42, %v4734_v0  ;;  %3335 = vmatprep.subr.bf16.mxu1 %v1527_v46  ;;  %v1506_v4 = vmax.f32 %v1440_v41, 0.0  ;;  %v4751_v46 = vadd.f32 %v4548_v16, %v4594_v15 }
 0x220   : > { %v1509_v55 = vmax.f32 %v1451_v1, 0.0 }
 0x221   : > { %v1507_v29 = vmax.f32 %v1443_v49, 0.0 }
 0x222   : > { %v1529_v62 = vpack.c.bf16 %v1509_v55, %v1508_v3  ;;  %3336 = vmatpush3.bf16.msra.mxu1 %v4625_v54  ;;  %v4764_v3 = vadd.f32 %v4552_v26, %v4594_v15  ;;  %v4778_v26 = vadd.f32 %v4594_v15, %v4558_v9 }
 0x223   : > { %v1528_v35 = vpack.c.bf16 %v1507_v29, %v1506_v4  ;;  %v3661_v51 = vpop.f32.mrb[40].mxu0  ;;  %v4768_v4 = vadd.f32 %v4594_v15, %v4554_v27 }
 0x224   : > { %v1464_v10 = vadd.f32 %v3661_v51, %v4742_v50  ;;  %v1455_v28 = vpop.f32.mrb[41].mxu0 }
 0x225   : > { %v1456_v41 = vadd.f32 %v1455_v28, %v4746_v47  ;;  %v3662_v13 = vpop.f32.mrb[42].mxu0  ;;  %3337 = vmatprep.subr.bf16.mxu1 %v1528_v35 }
 0x226   : > { %v1467_v1 = vadd.f32 %v3662_v13, %v4751_v46  ;;  %v1458_v54 = vpop.f32.mrb[43].mxu0  ;;  %3338 = vmatpush3.bf16.msra.mxu1 %v4657_v33  ;;  %v1512_v16 = vmax.f32 %v1464_v10, 0.0 }
 0x227   : > { %v1459_v42 = vadd.f32 %v1458_v54, %v4756_v12  ;;  %3339 = vmatprep.subr.bf16.mxu1 %v1529_v62  ;;  %v1510_v17 = vmax.f32 %v1456_v41, 0.0  ;;  %v4773_v62 = vadd.f32 %v4556_v20, %v4594_v15  ;;  %v778_v15 = vadd.s32 16, %v4562_v21 }
 0x228   : > { %v1513_v49 = vmax.f32 %v1467_v1, 0.0 }
 0x229   : > { %v1511_v55 = vmax.f32 %v1459_v42, 0.0  ;;  %vm806_vm10 = vcmp.eq.s32.totalorder %v778_v15, %v4571_v2  ;;  %vm805_vm14 = vcmp.eq.s32.totalorder %v778_v15, %v4569_v5  ;;  %v791_v15 = vadd.s32 120, %v4562_v21 }
 0x22a   : > { %v1531_v29 = vpack.c.bf16 %v1513_v49, %v1512_v16  ;;  %3340 = vmatpush3.bf16.msra.mxu1 %v4655_v63  ;;  %v779_v49 = vadd.s32 24, %v4562_v21 }
 0x22b   : > { %v1530_v35 = vpack.c.bf16 %v1511_v55, %v1510_v17  ;;  %v3665_v33 = vpop.f32.mrb[44].mxu0  ;;  %v781_v17 = vadd.s32 40, %v4562_v21  ;;  %v782_v55 = vadd.s32 48, %v4562_v21 }
 0x22c   : > { %v1480_v51 = vadd.f32 %v3665_v33, %v4764_v3  ;;  %v1471_v10 = vpop.f32.mrb[45].mxu0  ;;  %vm808_vm4 = vcmp.eq.s32.totalorder %v779_v49, %v4571_v2  ;;  %vm807_vm5 = vcmp.eq.s32.totalorder %v779_v49, %v4569_v5  ;;  %v5587_v33 = vmov 0 }
 0x22d   : > { %v1472_v28 = vadd.f32 %v1471_v10, %v4768_v4  ;;  %v3666_v27 = vpop.f32.mrb[46].mxu0  ;;  %3341 = vmatprep.subr.bf16.mxu1 %v1530_v35  ;;  %vm4791_vm3 = vmpackc.low %vm808_vm4, %vm806_vm10  ;;  %vm812_vm4 = vcmp.eq.s32.totalorder %v781_v17, %v4571_v2  ;;  %v5585_v35 = vmov 0  ;;  %v785_v10 = vadd.s32 72, %v4562_v21 }
 0x22e   : > { %v1483_v41 = vadd.f32 %v3666_v27, %v4773_v62  ;;  %v1474_v63 = vpop.f32.mrb[47].mxu0  ;;  %3342 = vmatpush3.bf16.msra.mxu1 %v4681_v38  ;;  %v1516_v20 = vmax.f32 %v1480_v51, 0.0  ;;  %v5579_v38 = vmov 0  ;;  %vm4807_vm7 = vmpackc.low %vm807_vm5, %vm805_vm14  ;;  %vm811_vm14 = vcmp.eq.s32.totalorder %v781_v17, %v4569_v5  ;;  %v3934_v17 = vld [vmem:[%s5413_s9 + $0x20] sm:$0xff]  }
 0x22f   : > { %v1475_v13 = vadd.f32 %v1474_v63, %v4778_v26  ;;  %3343 = vmatprep.subr.bf16.mxu1 %v1531_v29  ;;  %v1514_v54 = vmax.f32 %v1472_v28, 0.0  ;;  %v5580_v38 = vsel %vm4791_vm3, 4294967295, %v5579_v38  ;;  %v783_v29 = vadd.s32 56, %v4562_v21  ;;  %3675 = vmatprep.subr.bf16.mxu0 %v3934_v17 }
 0x230   : > { %v1517_v1 = vmax.f32 %v1483_v41, 0.0  ;;  %v784_v51 = vadd.s32 64, %v4562_v21  ;;  %v5589_v28 = vmov 0  ;;  %v5591_v27 = vmov 0  ;;  %3676 = vmatpush3.bf16.msra.mxu0 %v3934_v17 }
 0x231   : > { %v1515_v42 = vmax.f32 %v1475_v13, 0.0  ;;  %v786_v41 = vadd.s32 80, %v4562_v21  ;;  %v787_v63 = vadd.s32 88, %v4562_v21  ;;  %v5593_v13 = vmov 0 }
 0x232   : > { %v1533_v16 = vpack.c.bf16 %v1517_v1, %v1516_v20  ;;  %3344 = vmatpush3.bf16.msra.mxu1 %v4679_v30  ;;  %v780_v30 = vadd.s32 32, %v4562_v21  ;;  %v5595_v20 = vmov 0  ;;  %v788_v1 = vadd.s32 96, %v4562_v21 }
 0x233   : > { %v1532_v9 = vpack.c.bf16 %v1515_v42, %v1514_v54  ;;  %v789_v54 = vadd.s32 104, %v4562_v21  ;;  %v5597_v42 = vmov 0  ;;  %v5602_v49 = vmov 0 }
 0x234   : > { %vm810_vm10 = vcmp.eq.s32.totalorder %v780_v30, %v4571_v2  ;;  %vm809_vm5 = vcmp.eq.s32.totalorder %v780_v30, %v4569_v5  ;;  %v5605_v30 = vmov 0 }
 0x235   : > { %3345 = vmatprep.subr.bf16.mxu1 %v1532_v9  ;;  %vm4811_vm0 = vmpackc.low %vm812_vm4, %vm810_vm10  ;;  %vm814_vm10 = vcmp.eq.s32.totalorder %v782_v55, %v4571_v2  ;;  %vm816_vm4 = vcmp.eq.s32.totalorder %v783_v29, %v4571_v2  ;;  %v790_v9 = vadd.s32 112, %v4562_v21 }
 0x236   : > { %3346 = vmatpush3.bf16.msra.mxu1 %v4705_v32  ;;  %v5583_v32 = vmov 0 }
 0x237   : > { %3347 = vmatprep.subr.bf16.mxu1 %v1533_v16  ;;  %v5584_v32 = vsel %vm4811_vm0, 4294967295, %v5583_v32  ;;  %v5599_v16 = vmov 0 }
 0x23a   : > { %3348 = vmatpush3.bf16.msra.mxu1 %v4703_v39  ;;  %v5581_v39 = vmov 0 }
 0x23b   : > { %v5582_v39 = vsel %vm4807_vm7, 4294967295, %v5581_v39 }
 0x23d   : > { %3102 = vmatmul.mubr.msk.bf16.vlgmr.msra.gmra.mrb[32].mxu1 %vm4587_vm13, %v5564_v18  ;;  %vm4831_vm13 = vmpackc.low %vm816_vm4, %vm814_vm10  ;;  %vm818_vm10 = vcmp.eq.s32.totalorder %v784_v51, %v4571_v2  ;;  %vm820_vm4 = vcmp.eq.s32.totalorder %v785_v10, %v4571_v2 }
 0x23e   : > { %3104 = vmatprep.mubr.msk.bf16.mxu1 %vm4791_vm3, %v5564_v18  ;;  %vm4827_vm3 = vmpackc.low %vm811_vm14, %vm809_vm5  ;;  %v5588_v33 = vsel %vm4831_vm13, 4294967295, %v5587_v33  ;;  %vm813_vm5 = vcmp.eq.s32.totalorder %v782_v55, %v4569_v5  ;;  %vm815_vm14 = vcmp.eq.s32.totalorder %v783_v29, %v4569_v5  ;;  %v3936_v55 = vld [vmem:[%s5413_s9 + $0x30] sm:$0xff]   ;;  %v3938_v29 = vld [vmem:[%s5415_s11] sm:$0xff]  }
 0x23f   : > { %v5586_v35 = vsel %vm4827_vm3, 4294967295, %v5585_v35 }
 0x245   : > { %3106 = vmatmul.mubr.msk.bf16.gmra.mrb[36].mxu1 %vm4807_vm7, %v5564_v18  ;;  %vm4851_vm7 = vmpackc.low %vm820_vm4, %vm818_vm10  ;;  %vm822_vm10 = vcmp.eq.s32.totalorder %v786_v41, %v4571_v2  ;;  %vm824_vm4 = vcmp.eq.s32.totalorder %v787_v63, %v4571_v2 }
 0x246   : > { %3108 = vmatprep.mubr.msk.bf16.mxu1 %vm4811_vm0, %v5564_v18  ;;  %vm4847_vm0 = vmpackc.low %vm815_vm14, %vm813_vm5  ;;  %v5592_v27 = vsel %vm4851_vm7, 4294967295, %v5591_v27  ;;  %vm817_vm5 = vcmp.eq.s32.totalorder %v784_v51, %v4569_v5  ;;  %vm819_vm14 = vcmp.eq.s32.totalorder %v785_v10, %v4569_v5 }
 0x247   : > { %v5590_v28 = vsel %vm4847_vm0, 4294967295, %v5589_v28 }
 0x24d   : > { %3110 = vmatmul.mubr.msk.bf16.gmra.mrb[40].mxu1 %vm4827_vm3, %v5564_v18  ;;  %vm4871_vm3 = vmpackc.low %vm824_vm4, %vm822_vm10  ;;  %vm826_vm10 = vcmp.eq.s32.totalorder %v788_v1, %v4571_v2  ;;  %vm828_vm4 = vcmp.eq.s32.totalorder %v789_v54, %v4571_v2 }
 0x24e   : > { %3112 = vmatprep.mubr.msk.bf16.mxu1 %vm4831_vm13, %v5564_v18  ;;  %vm4867_vm13 = vmpackc.low %vm819_vm14, %vm817_vm5  ;;  %v5596_v20 = vsel %vm4871_vm3, 4294967295, %v5595_v20  ;;  %vm821_vm5 = vcmp.eq.s32.totalorder %v786_v41, %v4569_v5  ;;  %vm823_vm14 = vcmp.eq.s32.totalorder %v787_v63, %v4569_v5 }
 0x24f   : > { %v5594_v13 = vsel %vm4867_vm13, 4294967295, %v5593_v13 }
 0x255   : > { %3114 = vmatmul.mubr.msk.bf16.gmra.mrb[44].mxu1 %vm4847_vm0, %v5564_v18  ;;  %vm4891_vm0 = vmpackc.low %vm828_vm4, %vm826_vm10  ;;  %vm830_vm10 = vcmp.eq.s32.totalorder %v790_v9, %v4571_v2  ;;  %vm832_vm4 = vcmp.eq.s32.totalorder %v791_v15, %v4571_v2  ;;  %v5608_v2 = vmov 0 }
 0x256   : > { %3116 = vmatprep.mubr.msk.bf16.mxu1 %vm4851_vm7, %v5564_v18  ;;  %vm4887_vm7 = vmpackc.low %vm823_vm14, %vm821_vm5  ;;  %v5600_v16 = vsel %vm4891_vm0, 4294967295, %v5599_v16  ;;  %vm825_vm5 = vcmp.eq.s32.totalorder %v788_v1, %v4569_v5  ;;  %vm827_vm14 = vcmp.eq.s32.totalorder %v789_v54, %v4569_v5 }
 0x257   : > { %v5598_v42 = vsel %vm4887_vm7, 4294967295, %v5597_v42  ;;  %5601 = vst [vmem:[#allocation36_spill] sm:$0xff] %v5600_v16 }
 0x25d   : > { %3118 = vmatmul.mubr.msk.bf16.gmra.mrb[48].mxu1 %vm4867_vm13, %v5564_v18  ;;  %vm4911_vm13 = vmpackc.low %vm832_vm4, %vm830_vm10  ;;  %vm5657_vm10 = vnez %v5582_v39  ;;  %vm5658_vm4 = vnez %v5584_v32  ;;  %v3951_v39 = vld [vmem:[%s5413_s9 + $0x68] sm:$0xff]   ;;  %v3952_v32 = vld [vmem:[%s5413_s9 + $0x70] sm:$0xff]  }
 0x25e   : > { %3120 = vmatprep.mubr.msk.bf16.mxu1 %vm4871_vm3, %v5564_v18  ;;  %vm4907_vm3 = vmpackc.low %vm827_vm14, %vm825_vm5  ;;  %v5606_v30 = vsel %vm4911_vm13, 4294967295, %v5605_v30  ;;  %vm5656_vm14 = vnez %v5580_v38  ;;  %v3950_v38 = vld [vmem:[%s5413_s9 + $0x60] sm:$0xff]  }
 0x25f   : > { %v5603_v49 = vsel %vm4907_vm3, 4294967295, %v5602_v49  ;;  %5607 = vst [vmem:[#allocation38_spill] sm:$0xff] %v5606_v30 }
 0x260   : > { %5604 = vst [vmem:[#allocation37_spill] sm:$0xff] %v5603_v49 }
 0x265   : > { %3122 = vmatmul.mubr.msk.bf16.gmra.mrb[52].mxu1 %vm4887_vm7, %v5564_v18  ;;  %vm831_vm7 = vcmp.eq.s32.totalorder %v791_v15, %v4569_v5 }
 0x266   : > { %3124 = vmatprep.mubr.msk.bf16.mxu1 %vm4891_vm0, %v5564_v18  ;;  %vm829_vm0 = vcmp.eq.s32.totalorder %v790_v9, %v4569_v5  ;;  %v3935_v5 = vld [vmem:[%s5413_s9 + $0x28] sm:$0xff]  }
 0x267   : > { %vm4923_vm5 = vmpackc.low %vm831_vm7, %vm829_vm0  ;;  %3677 = vmatprep.subr.bf16.mxu0 %v3935_v5 }
 0x268   : > { %v5609_v2 = vsel %vm4923_vm5, 4294967295, %v5608_v2  ;;  %3678 = vmatpush3.bf16.msra.mxu0 %v3935_v5 }
 0x269   : > { %5610 = vst [vmem:[#allocation39_spill] sm:$0xff] %v5609_v2  ;;  %3679 = vmatprep.subr.bf16.mxu0 %v3936_v55 }
 0x26c   : > { %3680 = vmatpush3.bf16.msra.mxu0 %v3936_v55 }
 0x26d   : > { %3126 = vmatmul.mubr.msk.bf16.gmra.mrb[56].mxu1 %vm4907_vm3, %v5564_v18  ;;  %3681 = vmatprep.subr.bf16.mxu0 %v3937_v19 }
 0x26e   : > { %3128 = vmatprep.mubr.msk.bf16.mxu1 %vm4911_vm13, %v5564_v18 }
 0x270   : > { %3682 = vmatpush3.bf16.msra.mxu0 %v3937_v19 }
 0x271   : > { %3699 = vmatprep.subr.bf16.mxu0 %v3938_v29 }
 0x275   : > { %3130 = vmatmul.mubr.msk.bf16.gmra.mrb[60].mxu1 %vm4923_vm5, %v5564_v18 }
 0x276   : > { %3747 = vmatprep.mubr.msk.bf16.mxu1 %vm4277_vm6, %v5564_v18 }
 0x310   : > { %v3349_v51 = vpop.f32.mrb[32].mxu1 }
 0x311   : > { %v3350_v10 = vpop.f32.mrb[33].mxu1 }
 0x312   : > { %v3351_v41 = vadd.f32 %v3350_v10, %v3349_v51  ;;  %v3352_v63 = vpop.f32.mrb[34].mxu1 }
 0x313   : > { %v3353_v1 = vpop.f32.mrb[35].mxu1 }
 0x314   : > { %v3354_v54 = vadd.f32 %v3353_v1, %v3352_v63  ;;  %v1631_v9 = vadd.f32 %v3351_v41, %v4321_v58  ;;  %v3939_v58 = vld [vmem:[%s5415_s11 + $0x8] sm:$0xff]  }
 0x316   : > { %v1632_v15 = vadd.f32 %v3354_v54, %v4325_v60 }
 0x318   : > { %v3355_v17 = vpop.f32.mrb[36].mxu1  ;;  %v1647_v5 = vpack.c.bf16 %v1632_v15, %v1631_v9 }
 0x319   : > { %v3356_v55 = vpop.f32.mrb[37].mxu1 }
 0x31a   : > { %v3357_v21 = vadd.f32 %v3356_v55, %v3355_v17  ;;  %v3358_v19 = vpop.f32.mrb[38].mxu1  ;;  %3683 = vmatprep.mubr.bf16.mxu0 %v1647_v5 }
 0x31b   : > { %v3359_v2 = vpop.f32.mrb[39].mxu1 }
 0x31c   : > { %v3360_v30 = vadd.f32 %v3359_v2, %v3358_v19  ;;  %v1633_v49 = vadd.f32 %v3357_v21, %v4327_v61  ;;  %v3940_v61 = vld [vmem:[%s5415_s11 + $0x10] sm:$0xff]  }
 0x31e   : > { %v1634_v16 = vadd.f32 %v3360_v30, %v4323_v59  ;;  %v3941_v30 = vld [vmem:[%s5415_s11 + $0x18] sm:$0xff]  }
 0x320   : > { %v1648_v51 = vpack.c.bf16 %v1634_v16, %v1633_v49  ;;  %v3361_v10 = vpop.f32.mrb[40].mxu1 }
 0x321   : > { %v3362_v41 = vpop.f32.mrb[41].mxu1 }
 0x322   : > { %v3363_v60 = vadd.f32 %v3362_v41, %v3361_v10  ;;  %v3364_v63 = vpop.f32.mrb[42].mxu1  ;;  %3684 = vmatmul.mubr.bf16.vlgmr.msra.gmra.mrb[48].mxu0 %v1648_v51  ;;  %v3943_v51 = vld [vmem:[%s5415_s11 + $0x28] sm:$0xff]  }
 0x323   : > { %v3365_v1 = vpop.f32.mrb[43].mxu1  ;;  %3700 = vmatpush3.bf16.msra.mxu0 %v3938_v29 }
 0x324   : > { %v3366_v54 = vadd.f32 %v3365_v1, %v3364_v63  ;;  %3701 = vmatprep.subr.bf16.mxu0 %v3939_v58  ;;  %v1635_v59 = vadd.f32 %v3363_v60, %v4333_v6  ;;  %v3942_v6 = vld [vmem:[%s5415_s11 + $0x20] sm:$0xff]  }
 0x326   : > { %v1636_v21 = vadd.f32 %v3366_v54, %v4337_v8 }
 0x327   : > { %3702 = vmatpush3.bf16.msra.mxu0 %v3939_v58 }
 0x328   : > { %v3367_v16 = vpop.f32.mrb[44].mxu1  ;;  %v1649_v49 = vpack.c.bf16 %v1636_v21, %v1635_v59  ;;  %3703 = vmatprep.subr.bf16.mxu0 %v3940_v61 }
 0x329   : > { %v3368_v2 = vpop.f32.mrb[45].mxu1 }
 0x32a   : > { %v3369_v29 = vadd.f32 %v3368_v2, %v3367_v16  ;;  %v3370_v9 = vpop.f32.mrb[46].mxu1  ;;  %3687 = vmatprep.mubr.bf16.mxu0 %v1649_v49 }
 0x32b   : > { %v3371_v15 = vpop.f32.mrb[47].mxu1  ;;  %3704 = vmatpush3.bf16.msra.mxu0 %v3940_v61 }
 0x32c   : > { %v3372_v17 = vadd.f32 %v3371_v15, %v3370_v9  ;;  %3705 = vmatprep.subr.bf16.mxu0 %v3941_v30  ;;  %v1637_v8 = vadd.f32 %v3369_v29, %v4339_v11 }
 0x32e   : > { %v1638_v5 = vadd.f32 %v3372_v17, %v4335_v7 }
 0x32f   : > { %3706 = vmatpush3.bf16.msra.mxu0 %v3941_v30 }
 0x330   : > { %v3373_v55 = vpop.f32.mrb[48].mxu1  ;;  %v1650_v19 = vpack.c.bf16 %v1638_v5, %v1637_v8  ;;  %3707 = vmatprep.subr.bf16.mxu0 %v3942_v6 }
 0x331   : > { %v3374_v10 = vpop.f32.mrb[49].mxu1 }
 0x332   : > { %v3375_v58 = vadd.f32 %v3374_v10, %v3373_v55  ;;  %v3376_v41 = vpop.f32.mrb[50].mxu1  ;;  %3688 = vmatmul.mubr.bf16.gmra.mrb[52].mxu0 %v1650_v19 }
 0x333   : > { %v3377_v60 = vpop.f32.mrb[51].mxu1  ;;  %3708 = vmatpush3.bf16.msra.mxu0 %v3942_v6 }
 0x334   : > { %v3378_v63 = vadd.f32 %v3377_v60, %v3376_v41  ;;  %3709 = vmatprep.subr.bf16.mxu0 %v3943_v51  ;;  %v1639_v11 = vadd.f32 %v3375_v58, %v4345_v22  ;;  %v5611_v41 = vld [vmem:[#allocation6_spill] sm:$0xff] }
 0x336   : > { %v1640_v7 = vadd.f32 %v3378_v63, %v4349_v24  ;;  %v5612_v63 = vld [vmem:[#allocation5_spill] sm:$0xff] }
 0x337   : > { %3710 = vmatpush3.bf16.msra.mxu0 %v3943_v51 }
 0x338   : > { %v3379_v1 = vpop.f32.mrb[52].mxu1  ;;  %v1651_v54 = vpack.c.bf16 %v1640_v7, %v1639_v11 }
 0x339   : > { %v3380_v61 = vpop.f32.mrb[53].mxu1 }
 0x33a   : > { %v3381_v59 = vadd.f32 %v3380_v61, %v3379_v1  ;;  %v3382_v21 = vpop.f32.mrb[54].mxu1  ;;  %3691 = vmatprep.mubr.bf16.mxu0 %v1651_v54  ;;  %v3131_v1 = vld [vmem:[%s5414_s10] ss:$0 sm:$0xff] }
 0x33b   : > { %v3383_v16 = vpop.f32.mrb[55].mxu1 }
 0x33c   : > { %v3384_v49 = vadd.f32 %v3383_v16, %v3382_v21  ;;  %v1641_v30 = vadd.f32 %v3381_v59, %v4351_v25 }
 0x33e   : > { %v1642_v2 = vadd.f32 %v3384_v49, %v4347_v23 }
 0x340   : > { %v3385_v29 = vpop.f32.mrb[56].mxu1  ;;  %v1652_v9 = vpack.c.bf16 %v1642_v2, %v1641_v30 }
 0x341   : > { %v3386_v15 = vpop.f32.mrb[57].mxu1 }
 0x342   : > { %v3387_v17 = vadd.f32 %v3386_v15, %v3385_v29  ;;  %v3388_v22 = vpop.f32.mrb[58].mxu1  ;;  %3692 = vmatmul.mubr.bf16.gmra.mrb[56].mxu0 %v1652_v9 }
 0x343   : > { %v3389_v24 = vpop.f32.mrb[59].mxu1 }
 0x344   : > { %v3390_v6 = vadd.f32 %v3389_v24, %v3388_v22  ;;  %v1643_v8 = vadd.f32 %v3387_v17, %v4357_v34  ;;  %v3944_v34 = vld [vmem:[%s5415_s11 + $0x30] sm:$0xff]  }
 0x345   : > { %3711 = vmatprep.subr.bf16.mxu0 %v3944_v34 }
 0x346   : > { %v1644_v5 = vadd.f32 %v3390_v6, %v4361_v36  ;;  %3712 = vmatpush3.bf16.msra.mxu0 %v3944_v34  ;;  %v3945_v36 = vld [vmem:[%s5415_s11 + $0x38] sm:$0xff]  }
 0x347   : > { %3713 = vmatprep.subr.bf16.mxu0 %v3945_v36 }
 0x348   : > { %v3391_v55 = vpop.f32.mrb[60].mxu1  ;;  %v1653_v19 = vpack.c.bf16 %v1644_v5, %v1643_v8 }
 0x349   : > { %v3392_v51 = vpop.f32.mrb[61].mxu1 }
 0x34a   : > { %v3393_v10 = vadd.f32 %v3392_v51, %v3391_v55  ;;  %v3394_v58 = vpop.f32.mrb[62].mxu1  ;;  %3695 = vmatprep.mubr.bf16.mxu0 %v1653_v19  ;;  %3714 = vmatpush3.bf16.msra.mxu0 %v3945_v36 }
 0x34b   : > { %v3395_v25 = vpop.f32.mrb[63].mxu1 }
 0x34c   : > { %v3396_v23 = vadd.f32 %v3395_v25, %v3394_v58  ;;  %v1645_v60 = vadd.f32 %v3393_v10, %v5611_v41 }
 0x34e   : > { %v1646_v11 = vadd.f32 %v3396_v23, %v5612_v63 }
 0x350   : > { %v1654_v7 = vpack.c.bf16 %v1646_v11, %v1645_v60 }
 0x352   : > { %3696 = vmatmul.mubr.bf16.gmra.mrb[60].mxu0 %v1654_v7 }
 0x3f5   : > { %v3685_v54 = vpop.f32.mrb[48].mxu0 }
 0x3f6   : > { %v1769_v61 = vadd.f32 %v3685_v54, %v3131_v1  ;;  %v1760_v59 = vpop.f32.mrb[49].mxu0 }
 0x3f7   : > { %v1761_v21 = vadd.f32 %v3131_v1, %v1760_v59  ;;  %v3686_v16 = vpop.f32.mrb[50].mxu0 }
 0x3f8   : > { %v1772_v49 = vadd.f32 %v3686_v16, %v3131_v1  ;;  %v1763_v30 = vpop.f32.mrb[51].mxu0  ;;  %v1825_v29 = vmax.f32 %v1769_v61, 0.0 }
 0x3f9   : > { %v1764_v2 = vadd.f32 %v3131_v1, %v1763_v30  ;;  %v1823_v15 = vmax.f32 %v1761_v21, 0.0 }
 0x3fa   : > { %v1826_v9 = vmax.f32 %v1772_v49, 0.0 }
 0x3fb   : > { %v1824_v17 = vmax.f32 %v1764_v2, 0.0 }
 0x3fc   : > { %v1840_v22 = vpack.c.bf16 %v1826_v9, %v1825_v29 }
 0x3fd   : > { %v1839_v24 = vpack.c.bf16 %v1824_v17, %v1823_v15 }
 0x3ff   : > { %3715 = vmatprep.mubr.bf16.mxu0 %v1839_v24 }
 0x400   : > { %3716 = vmatmul.mubr.bf16.vlgmr.msra.gmra.mrb[64].mxu0 %v1840_v22 }
 0x405   : > { %v3689_v6 = vpop.f32.mrb[52].mxu0 }
 0x406   : > { %v1785_v8 = vadd.f32 %v3689_v6, %v3131_v1  ;;  %v1776_v5 = vpop.f32.mrb[53].mxu0 }
 0x407   : > { %v1777_v55 = vadd.f32 %v3131_v1, %v1776_v5  ;;  %v3690_v19 = vpop.f32.mrb[54].mxu0 }
 0x408   : > { %v1788_v51 = vadd.f32 %v3690_v19, %v3131_v1  ;;  %v1779_v10 = vpop.f32.mrb[55].mxu0  ;;  %v1829_v25 = vmax.f32 %v1785_v8, 0.0 }
 0x409   : > { %v1780_v58 = vadd.f32 %v3131_v1, %v1779_v10  ;;  %v1827_v41 = vmax.f32 %v1777_v55, 0.0 }
 0x40a   : > { %v1830_v23 = vmax.f32 %v1788_v51, 0.0 }
 0x40b   : > { %v1828_v60 = vmax.f32 %v1780_v58, 0.0 }
 0x40c   : > { %v1842_v63 = vpack.c.bf16 %v1830_v23, %v1829_v25 }
 0x40d   : > { %v1841_v11 = vpack.c.bf16 %v1828_v60, %v1827_v41 }
 0x40f   : > { %3719 = vmatprep.mubr.bf16.mxu0 %v1841_v11 }
 0x410   : > { %3720 = vmatmul.mubr.bf16.gmra.mrb[68].mxu0 %v1842_v63  ;;  %v3140_v63 = vld [vmem:[%s5416_s12] ss:$0 sm:$0xff] }
 0x415   : > { %v3693_v7 = vpop.f32.mrb[56].mxu0 }
 0x416   : > { %v1801_v34 = vadd.f32 %v3693_v7, %v3131_v1  ;;  %v1792_v36 = vpop.f32.mrb[57].mxu0 }
 0x417   : > { %v1793_v54 = vadd.f32 %v3131_v1, %v1792_v36  ;;  %v3694_v61 = vpop.f32.mrb[58].mxu0 }
 0x418   : > { %v1804_v59 = vadd.f32 %v3694_v61, %v3131_v1  ;;  %v1795_v21 = vpop.f32.mrb[59].mxu0  ;;  %v1833_v49 = vmax.f32 %v1801_v34, 0.0 }
 0x419   : > { %v1796_v16 = vadd.f32 %v3131_v1, %v1795_v21  ;;  %v1831_v2 = vmax.f32 %v1793_v54, 0.0 }
 0x41a   : > { %v1834_v30 = vmax.f32 %v1804_v59, 0.0 }
 0x41b   : > { %v1832_v29 = vmax.f32 %v1796_v16, 0.0 }
 0x41c   : > { %v1844_v9 = vpack.c.bf16 %v1834_v30, %v1833_v49 }
 0x41d   : > { %v1843_v15 = vpack.c.bf16 %v1832_v29, %v1831_v2 }
 0x41f   : > { %3723 = vmatprep.mubr.bf16.mxu0 %v1843_v15 }
 0x420   : > { %3724 = vmatmul.mubr.bf16.gmra.mrb[72].mxu0 %v1844_v9 }
 0x425   : > { %v3697_v17 = vpop.f32.mrb[60].mxu0 }
 0x426   : > { %v1817_v22 = vadd.f32 %v3697_v17, %v3131_v1  ;;  %v1808_v24 = vpop.f32.mrb[61].mxu0 }
 0x427   : > { %v1809_v6 = vadd.f32 %v3131_v1, %v1808_v24  ;;  %v3698_v8 = vpop.f32.mrb[62].mxu0 }
 0x428   : > { %v1820_v5 = vadd.f32 %v3698_v8, %v3131_v1  ;;  %v1811_v55 = vpop.f32.mrb[63].mxu0  ;;  %v1837_v51 = vmax.f32 %v1817_v22, 0.0 }
 0x429   : > { %v1812_v19 = vadd.f32 %v3131_v1, %v1811_v55  ;;  %v1835_v58 = vmax.f32 %v1809_v6, 0.0 }
 0x42a   : > { %v1838_v10 = vmax.f32 %v1820_v5, 0.0 }
 0x42b   : > { %v1836_v25 = vmax.f32 %v1812_v19, 0.0 }
 0x42c   : > { %v1846_v23 = vpack.c.bf16 %v1838_v10, %v1837_v51 }
 0x42d   : > { %v1845_v41 = vpack.c.bf16 %v1836_v25, %v1835_v58 }
 0x42f   : > { %3727 = vmatprep.mubr.bf16.mxu0 %v1845_v41 }
 0x430   : > { %3728 = vmatmul.mubr.bf16.gmra.mrb[76].mxu0 %v1846_v23 }
 0x431   : > { %3182 = vmatprep.mubr.msk.bf16.mxu0 %vm4580_vm15, %v5564_v18  ;;  %vm5655_vm15 = vnez %v5566_v14  ;;  %v5666_v14 = vld [vmem:[#allocation36_spill] sm:$0xff] }
 0x4d3   : > { %v3717_v11 = vpop.f32.mrb[64].mxu0 }
 0x4d4   : > { %v1952_v7 = vpop.f32.mrb[65].mxu0  ;;  %v4998_v61 = vadd.f32 %v3717_v11, %v3140_v63 }
 0x4d5   : > { %v4994_v34 = vadd.f32 %v3140_v63, %v1952_v7  ;;  %v3718_v1 = vpop.f32.mrb[66].mxu0 }
 0x4d6   : > { %v4996_v36 = vadd.f32 %v3718_v1, %v3140_v63  ;;  %v1955_v54 = vpop.f32.mrb[67].mxu0  ;;  %v5492_v30 = vmax.f32 %v4998_v61, 0.0 }
 0x4d7   : > { %v5000_v59 = vadd.f32 %v3140_v63, %v1955_v54  ;;  %v5494_v21 = vmax.f32 %v4994_v34, 0.0 }
 0x4d8   : > { %v5491_v16 = vmax.f32 %v4996_v36, 0.0 }
 0x4d9   : > { %v5493_v49 = vmax.f32 %v5000_v59, 0.0 }
 0x4da   : > { %v2032_v29 = vpack.c.bf16 %v5491_v16, %v5492_v30 }
 0x4db   : > { %v2031_v2 = vpack.c.bf16 %v5493_v49, %v5494_v21 }
 0x4dd   : > { %3731 = vmatprep.subr.bf16.mxu1 %v2031_v2 }
 0x4de   : > { %3732 = vmatpush3.bf16.msra.mxu1 %v2031_v2 }
 0x4df   : > { %3733 = vmatprep.subr.bf16.mxu1 %v2032_v29 }
 0x4e2   : > { %3734 = vmatpush3.bf16.msra.mxu1 %v2032_v29 }
 0x4e3   : > { %v3721_v9 = vpop.f32.mrb[68].mxu0 }
 0x4e4   : > { %v1968_v15 = vpop.f32.mrb[69].mxu0  ;;  %v5018_v8 = vadd.f32 %v3721_v9, %v3140_v63 }
 0x4e5   : > { %v5014_v17 = vadd.f32 %v3140_v63, %v1968_v15  ;;  %v3722_v22 = vpop.f32.mrb[70].mxu0 }
 0x4e6   : > { %v5016_v24 = vadd.f32 %v3722_v22, %v3140_v63  ;;  %v1971_v6 = vpop.f32.mrb[71].mxu0  ;;  %v5480_v10 = vmax.f32 %v5018_v8, 0.0 }
 0x4e7   : > { %v5020_v5 = vadd.f32 %v3140_v63, %v1971_v6  ;;  %v5490_v55 = vmax.f32 %v5014_v17, 0.0 }
 0x4e8   : > { %v5479_v19 = vmax.f32 %v5016_v24, 0.0 }
 0x4e9   : > { %v5489_v51 = vmax.f32 %v5020_v5, 0.0 }
 0x4ea   : > { %v2034_v25 = vpack.c.bf16 %v5479_v19, %v5480_v10 }
 0x4eb   : > { %v2033_v58 = vpack.c.bf16 %v5489_v51, %v5490_v55  ;;  %v5645_v51 = vld [vmem:[#allocation26_spill] sm:$0xff] }
 0x4ed   : > { %3735 = vmatprep.subr.bf16.mxu1 %v2033_v58 }
 0x4ee   : > { %3736 = vmatpush3.bf16.msra.mxu1 %v2033_v58 }
 0x4ef   : > { %3737 = vmatprep.subr.bf16.mxu1 %v2034_v25 }
 0x4f2   : > { %3738 = vmatpush3.bf16.msra.mxu1 %v2034_v25 }
 0x4f3   : > { %v3725_v23 = vpop.f32.mrb[72].mxu0 }
 0x4f4   : > { %v1984_v41 = vpop.f32.mrb[73].mxu0  ;;  %v5038_v54 = vadd.f32 %v3725_v23, %v3140_v63 }
 0x4f5   : > { %v5034_v60 = vadd.f32 %v3140_v63, %v1984_v41  ;;  %v3726_v11 = vpop.f32.mrb[74].mxu0 }
 0x4f6   : > { %v5036_v7 = vadd.f32 %v3726_v11, %v3140_v63  ;;  %v1987_v1 = vpop.f32.mrb[75].mxu0  ;;  %v5488_v22 = vmax.f32 %v5038_v54, 0.0 }
 0x4f7   : > { %v5040_v2 = vadd.f32 %v3140_v63, %v1987_v1  ;;  %v5482_v29 = vmax.f32 %v5034_v60, 0.0 }
 0x4f8   : > { %5614 = vst [vmem:[#allocation6_spill] sm:$0xff] %v5036_v7  ;;  %v5483_v9 = vmax.f32 %v5036_v7, 0.0  ;;  %v5652_v7 = vld [vmem:[#allocation33_spill] sm:$0xff] }
 0x4f9   : > { %v5481_v15 = vmax.f32 %v5040_v2, 0.0 }
 0x4fa   : > { %v2036_v58 = vpack.c.bf16 %v5483_v9, %v5488_v22 }
 0x4fb   : > { %v2035_v6 = vpack.c.bf16 %v5481_v15, %v5482_v29 }
 0x4fd   : > { %3739 = vmatprep.subr.bf16.mxu1 %v2035_v6 }
 0x4fe   : > { %3740 = vmatpush3.bf16.msra.mxu1 %v2035_v6 }
 0x4ff   : > { %3741 = vmatprep.subr.bf16.mxu1 %v2036_v58 }
 0x502   : > { %3742 = vmatpush3.bf16.msra.mxu1 %v2036_v58 }
 0x503   : > { %v3729_v25 = vpop.f32.mrb[76].mxu0 }
 0x504   : > { %v2000_v23 = vpop.f32.mrb[77].mxu0  ;;  %v5058_v10 = vadd.f32 %v3729_v25, %v3140_v63 }
 0x505   : > { %v5054_v41 = vadd.f32 %v3140_v63, %v2000_v23  ;;  %v3730_v11 = vpop.f32.mrb[78].mxu0 }
 0x506   : > { %v5056_v1 = vadd.f32 %v3730_v11, %v3140_v63  ;;  %v2003_v19 = vpop.f32.mrb[79].mxu0  ;;  %5617 = vst [vmem:[#allocation40_spill] sm:$0xff] %v5058_v10  ;;  %v5486_v58 = vmax.f32 %v5058_v10, 0.0  ;;  %v5629_v11 = vld [vmem:[#allocation15_spill] sm:$0xff] }
 0x507   : > { %5615 = vst [vmem:[#allocation5_spill] sm:$0xff] %v5054_v41  ;;  %v5060_v15 = vadd.f32 %v3140_v63, %v2003_v19  ;;  %v5487_v29 = vmax.f32 %v5054_v41, 0.0  ;;  %v5625_v63 = vld [vmem:[#allocation13_spill] sm:$0xff]  ;;  %v5627_v19 = vld [vmem:[#allocation14_spill] sm:$0xff] }
 0x508   : > { %5616 = vst [vmem:[#allocation23_spill] sm:$0xff] %v5056_v1  ;;  %v5485_v9 = vmax.f32 %v5056_v1, 0.0  ;;  %vm5626_vm6 = vnez %v5625_v63  ;;  %v5637_v63 = vld [vmem:[#allocation19_spill] sm:$0xff] }
 0x509   : > { %5618 = vst [vmem:[#allocation41_spill] sm:$0xff] %v5060_v15  ;;  %v5484_v6 = vmax.f32 %v5060_v15, 0.0 }
 0x50a   : > { %v2038_v25 = vpack.c.bf16 %v5485_v9, %v5486_v58  ;;  %v5643_v9 = vld [vmem:[#allocation24_spill] sm:$0xff] }
 0x50b   : > { %v2037_v23 = vpack.c.bf16 %v5484_v6, %v5487_v29  ;;  %v5631_v6 = vld [vmem:[#allocation16_spill] sm:$0xff]  ;;  %v5644_v29 = vld [vmem:[#allocation25_spill] sm:$0xff] }
 0x50d   : > { %3743 = vmatprep.subr.bf16.mxu1 %v2037_v23 }
 0x50e   : > { %3744 = vmatpush3.bf16.msra.mxu1 %v2037_v23  ;;  %v5633_v23 = vld [vmem:[#allocation17_spill] sm:$0xff] }
 0x50f   : > { %3745 = vmatprep.subr.bf16.mxu1 %v2038_v25 }
 0x512   : > { %3746 = vmatpush3.bf16.msra.mxu1 %v2038_v25  ;;  %v5635_v25 = vld [vmem:[#allocation18_spill] sm:$0xff] }
 0x515   : > { %3748 = vmatmul.mubr.msk.bf16.vlgmr.msra.gmra.mrb[64].mxu1 %vm4375_vm11, %v5564_v18  ;;  %vm5628_vm11 = vnez %v5627_v19  ;;  %v5639_v19 = vld [vmem:[#allocation20_spill] sm:$0xff] }
 0x516   : > { %3751 = vmatprep.mubr.msk.bf16.mxu1 %vm4379_vm12, %v5564_v18  ;;  %vm5630_vm12 = vnez %v5629_v11  ;;  %vm5640_vm0 = vnez %v5639_v19  ;;  %v5641_v11 = vld [vmem:[#allocation21_spill] sm:$0xff] }
 0x517   : > { %vm5642_vm7 = vnez %v5641_v11  ;;  %v3947_v19 = vld [vmem:[%s5413_s9 + $0x48] sm:$0xff]   ;;  %v5646_v11 = vld [vmem:[#allocation27_spill] sm:$0xff] }
 0x51d   : > { %3752 = vmatmul.mubr.msk.bf16.gmra.mrb[68].mxu1 %vm4393_vm1, %v5564_v18  ;;  %vm5632_vm1 = vnez %v5631_v6 }
 0x51e   : > { %3755 = vmatprep.mubr.msk.bf16.mxu1 %vm4397_vm2, %v5564_v18  ;;  %vm5634_vm2 = vnez %v5633_v23 }
 0x525   : > { %3756 = vmatmul.mubr.msk.bf16.gmra.mrb[72].mxu1 %vm4411_vm8, %v5564_v18  ;;  %vm5636_vm8 = vnez %v5635_v25 }
 0x526   : > { %3759 = vmatprep.mubr.msk.bf16.mxu1 %vm4415_vm9, %v5564_v18  ;;  %vm5638_vm9 = vnez %v5637_v63  ;;  %v3946_v63 = vld [vmem:[%s5413_s9 + $0x40] sm:$0xff]  }
 0x527   : > { %3779 = vmatprep.subr.bf16.mxu1 %v3946_v63 }
 0x528   : > { %3780 = vmatpush3.bf16.msra.mxu1 %v3946_v63 }
 0x529   : > { %3781 = vmatprep.subr.bf16.mxu1 %v3947_v19 }
 0x52c   : > { %3782 = vmatpush3.bf16.msra.mxu1 %v3947_v19 }
 0x52d   : > { %3760 = vmatmul.mubr.msk.bf16.gmra.mrb[76].mxu1 %vm5626_vm6, %v5564_v18  ;;  %vm5659_vm6 = vnez %v5586_v35  ;;  %v3953_v35 = vld [vmem:[%s5413_s9 + $0x78] sm:$0xff]  }
 0x52e   : > { %3763 = vmatprep.mubr.msk.bf16.mxu1 %vm5628_vm11, %v5564_v18  ;;  %vm5660_vm11 = vnez %v5588_v33  ;;  %v3954_v33 = vld [vmem:[%s5415_s11 + $0x40] sm:$0xff]  }
 0x535   : > { %3764 = vmatmul.mubr.msk.bf16.gmra.mrb[80].mxu1 %vm5630_vm12, %v5564_v18  ;;  %vm5661_vm12 = vnez %v5590_v28  ;;  %v3955_v28 = vld [vmem:[%s5415_s11 + $0x48] sm:$0xff]  }
 0x536   : > { %3767 = vmatprep.mubr.msk.bf16.mxu1 %vm5632_vm1, %v5564_v18  ;;  %vm5662_vm1 = vnez %v5592_v27  ;;  %v3956_v27 = vld [vmem:[%s5415_s11 + $0x50] sm:$0xff]  }
 0x53d   : > { %3768 = vmatmul.mubr.msk.bf16.gmra.mrb[84].mxu1 %vm5634_vm2, %v5564_v18  ;;  %vm5663_vm2 = vnez %v5594_v13  ;;  %v3957_v13 = vld [vmem:[%s5415_s11 + $0x58] sm:$0xff]  }
 0x53e   : > { %3771 = vmatprep.mubr.msk.bf16.mxu1 %vm5636_vm8, %v5564_v18  ;;  %vm5664_vm8 = vnez %v5596_v20  ;;  %v3958_v20 = vld [vmem:[%s5415_s11 + $0x60] sm:$0xff]  }
 0x545   : > { %3772 = vmatmul.mubr.msk.bf16.gmra.mrb[88].mxu1 %vm5638_vm9, %v5564_v18  ;;  %vm5665_vm9 = vnez %v5598_v42  ;;  %v3959_v42 = vld [vmem:[%s5415_s11 + $0x68] sm:$0xff]  }
 0x546   : > { %3775 = vmatprep.mubr.msk.bf16.mxu1 %vm5640_vm0, %v5564_v18  ;;  %vm5667_vm0 = vnez %v5666_v14 }
 0x54d   : > { %3776 = vmatmul.mubr.msk.bf16.gmra.mrb[92].mxu1 %vm5642_vm7, %v5564_v18 }
 0x5e8   : > { %v3749_v6 = vpop.f32.mrb[64].mxu1 }
 0x5e9   : > { %v2082_v23 = vadd.f32 %v3749_v6, %v5643_v9  ;;  %v2073_v58 = vpop.f32.mrb[65].mxu1 }
 0x5ea   : > { %v2074_v22 = vadd.f32 %v2073_v58, %v5644_v29  ;;  %v3750_v25 = vpop.f32.mrb[66].mxu1  ;;  %v3948_v58 = vld [vmem:[%s5413_s9 + $0x50] sm:$0xff]  }
 0x5eb   : > { %v2085_v55 = vadd.f32 %v3750_v25, %v5645_v51  ;;  %v2076_v16 = vpop.f32.mrb[67].mxu1  ;;  %v2202_v49 = vmax.f32 %v2082_v23, 0.0  ;;  %v5647_v51 = vld [vmem:[#allocation28_spill] sm:$0xff]  ;;  %3783 = vmatprep.subr.bf16.mxu1 %v3948_v58 }
 0x5ec   : > { %v2077_v30 = vadd.f32 %v2076_v16, %v5646_v11  ;;  %v2200_v6 = vmax.f32 %v2074_v22, 0.0  ;;  %v5648_v16 = vld [vmem:[#allocation29_spill] sm:$0xff]  ;;  %v5649_v22 = vld [vmem:[#allocation30_spill] sm:$0xff]  ;;  %3784 = vmatpush3.bf16.msra.mxu1 %v3948_v58 }
 0x5ed   : > { %v2203_v9 = vmax.f32 %v2085_v55, 0.0 }
 0x5ee   : > { %v2201_v29 = vmax.f32 %v2077_v30, 0.0  ;;  %v3949_v30 = vld [vmem:[%s5413_s9 + $0x58] sm:$0xff]  }
 0x5ef   : > { %v5132_v21 = vpack.c.bf16 %v2203_v9, %v2202_v49  ;;  %3785 = vmatprep.subr.bf16.mxu1 %v3949_v30 }
 0x5f0   : > { %v5134_v1 = vpack.c.bf16 %v2201_v29, %v2200_v6  ;;  %v3753_v10 = vpop.f32.mrb[68].mxu1  ;;  %3786 = vmatpush3.bf16.msra.mxu1 %v3949_v30 }
 0x5f1   : > { %v2098_v25 = vadd.f32 %v3753_v10, %v5647_v51  ;;  %v2089_v15 = vpop.f32.mrb[69].mxu1  ;;  %3787 = vmatprep.subr.bf16.mxu1 %v3950_v38 }
 0x5f2   : > { %v2090_v23 = vadd.f32 %v2089_v15, %v5648_v16  ;;  %v3754_v55 = vpop.f32.mrb[70].mxu1 }
 0x5f3   : > { %v2101_v63 = vadd.f32 %v3754_v55, %v5649_v22  ;;  %v2092_v11 = vpop.f32.mrb[71].mxu1  ;;  %v2206_v9 = vmax.f32 %v2098_v25, 0.0 }
 0x5f4   : > { %v2093_v49 = vadd.f32 %v2092_v11, %v4639_v37  ;;  %v2204_v29 = vmax.f32 %v2090_v23, 0.0  ;;  %3788 = vmatpush3.bf16.msra.mxu1 %v3950_v38 }
 0x5f5   : > { %v2207_v6 = vmax.f32 %v2101_v63, 0.0  ;;  %v5650_v63 = vld [vmem:[#allocation31_spill] sm:$0xff]  ;;  %3789 = vmatprep.subr.bf16.mxu1 %v3951_v39 }
 0x5f6   : > { %v2205_v10 = vmax.f32 %v2093_v49, 0.0 }
 0x5f7   : > { %v5143_v19 = vpack.c.bf16 %v2207_v6, %v2206_v9 }
 0x5f8   : > { %v5145_v15 = vpack.c.bf16 %v2205_v10, %v2204_v29  ;;  %v3757_v51 = vpop.f32.mrb[72].mxu1  ;;  %3790 = vmatpush3.bf16.msra.mxu1 %v3951_v39 }
 0x5f9   : > { %v2114_v16 = vadd.f32 %v3757_v51, %v4649_v40  ;;  %v2105_v41 = vpop.f32.mrb[73].mxu1  ;;  %v5651_v40 = vld [vmem:[#allocation32_spill] sm:$0xff]  ;;  %3791 = vmatprep.subr.bf16.mxu1 %v3952_v32 }
 0x5fa   : > { %v2106_v55 = vadd.f32 %v2105_v41, %v4653_v31  ;;  %v3758_v22 = vpop.f32.mrb[74].mxu1 }
 0x5fb   : > { %v2117_v37 = vadd.f32 %v3758_v22, %v4661_v44  ;;  %v2108_v25 = vpop.f32.mrb[75].mxu1  ;;  %v2210_v23 = vmax.f32 %v2114_v16, 0.0 }
 0x5fc   : > { %v2109_v58 = vadd.f32 %v2108_v25, %v5650_v63  ;;  %v2208_v49 = vmax.f32 %v2106_v55, 0.0  ;;  %3792 = vmatpush3.bf16.msra.mxu1 %v3952_v32  ;;  %v5679_v32 = vmax.f32 %v5034_v60, 0.0 }
 0x5fd   : > { %v2211_v11 = vmax.f32 %v2117_v37, 0.0  ;;  %3793 = vmatprep.subr.bf16.mxu1 %v3953_v35 }
 0x5fe   : > { %v2209_v9 = vmax.f32 %v2109_v58, 0.0 }
 0x5ff   : > { %v5151_v6 = vpack.c.bf16 %v2211_v11, %v2210_v23 }
 0x600   : > { %v5153_v29 = vpack.c.bf16 %v2209_v9, %v2208_v49  ;;  %v3761_v10 = vpop.f32.mrb[76].mxu1  ;;  %v5653_v49 = vld [vmem:[#allocation34_spill] sm:$0xff]  ;;  %3794 = vmatpush3.bf16.msra.mxu1 %v3953_v35 }
 0x601   : > { %v2130_v51 = vadd.f32 %v3761_v10, %v5651_v40  ;;  %v2121_v30 = vpop.f32.mrb[77].mxu1  ;;  %v5654_v40 = vld [vmem:[#allocation35_spill] sm:$0xff] }
 0x602   : > { %v2122_v31 = vadd.f32 %v2121_v30, %v4677_v43  ;;  %v3762_v41 = vpop.f32.mrb[78].mxu1 }
 0x603   : > { %v2133_v44 = vadd.f32 %v3762_v41, %v4685_v45  ;;  %v2124_v22 = vpop.f32.mrb[79].mxu1  ;;  %v2214_v16 = vmax.f32 %v2130_v51, 0.0 }
 0x604   : > { %v2125_v25 = vadd.f32 %v2124_v22, %v5652_v7  ;;  %v2212_v55 = vmax.f32 %v2122_v31, 0.0 }
 0x605   : > { %v2215_v37 = vmax.f32 %v2133_v44, 0.0 }
 0x606   : > { %v2213_v63 = vmax.f32 %v2125_v25, 0.0 }
 0x607   : > { %v5159_v58 = vpack.c.bf16 %v2215_v37, %v2214_v16 }
 0x608   : > { %v5161_v23 = vpack.c.bf16 %v2213_v63, %v2212_v55  ;;  %v3765_v11 = vpop.f32.mrb[80].mxu1 }
 0x609   : > { %v2146_v9 = vadd.f32 %v3765_v11, %v5653_v49  ;;  %v2137_v10 = vpop.f32.mrb[81].mxu1 }
 0x60a   : > { %v2138_v43 = vadd.f32 %v2137_v10, %v5654_v40  ;;  %v3766_v30 = vpop.f32.mrb[82].mxu1 }
 0x60b   : > { %v2149_v45 = vadd.f32 %v3766_v30, %v4709_v48  ;;  %v2140_v41 = vpop.f32.mrb[83].mxu1  ;;  %v2218_v51 = vmax.f32 %v2146_v9, 0.0 }
 0x60c   : > { %v2141_v7 = vadd.f32 %v2140_v41, %v4714_v52  ;;  %v2216_v31 = vmax.f32 %v2138_v43, 0.0 }
 0x60d   : > { %v2219_v44 = vmax.f32 %v2149_v45, 0.0 }
 0x60e   : > { %v2217_v22 = vmax.f32 %v2141_v7, 0.0 }
 0x60f   : > { %v2241_v25 = vpack.c.bf16 %v2219_v44, %v2218_v51 }
 0x610   : > { %v2240_v16 = vpack.c.bf16 %v2217_v22, %v2216_v31  ;;  %v3769_v37 = vpop.f32.mrb[84].mxu1 }
 0x611   : > { %v2162_v55 = vadd.f32 %v3769_v37, %v4721_v56  ;;  %v2153_v63 = vpop.f32.mrb[85].mxu1 }
 0x612   : > { %v2154_v11 = vadd.f32 %v2153_v63, %v4725_v57  ;;  %v3770_v49 = vpop.f32.mrb[86].mxu1  ;;  %3453 = vmatprep.subr.bf16.mxu0 %v2240_v16 }
 0x613   : > { %v2165_v10 = vadd.f32 %v3770_v49, %v4729_v53  ;;  %v2156_v48 = vpop.f32.mrb[87].mxu1  ;;  %3454 = vmatpush3.bf16.msra.mxu0 %v5134_v1  ;;  %v2222_v9 = vmax.f32 %v2162_v55, 0.0 }
 0x614   : > { %v2157_v52 = vadd.f32 %v2156_v48, %v4734_v0  ;;  %3455 = vmatprep.subr.bf16.mxu0 %v2241_v25  ;;  %v2220_v43 = vmax.f32 %v2154_v11, 0.0 }
 0x615   : > { %v2223_v40 = vmax.f32 %v2165_v10, 0.0 }
 0x616   : > { %v2221_v30 = vmax.f32 %v2157_v52, 0.0 }
 0x617   : > { %v2243_v45 = vpack.c.bf16 %v2223_v40, %v2222_v9  ;;  %3456 = vmatpush3.bf16.msra.mxu0 %v5132_v21 }
 0x618   : > { %v2242_v56 = vpack.c.bf16 %v2221_v30, %v2220_v43  ;;  %v3773_v41 = vpop.f32.mrb[88].mxu1  ;;  %v5671_v43 = vmax.f32 %v4994_v34, 0.0 }
 0x619   : > { %v2178_v57 = vadd.f32 %v3773_v41, %v4742_v50  ;;  %v2169_v7 = vpop.f32.mrb[89].mxu1 }
 0x61a   : > { %v2170_v53 = vadd.f32 %v2169_v7, %v4746_v47  ;;  %v3774_v51 = vpop.f32.mrb[90].mxu1  ;;  %3457 = vmatprep.subr.bf16.mxu0 %v2242_v56 }
 0x61b   : > { %v2181_v1 = vadd.f32 %v3774_v51, %v4751_v46  ;;  %v2172_v0 = vpop.f32.mrb[91].mxu1  ;;  %3458 = vmatpush3.bf16.msra.mxu0 %v5145_v15  ;;  %v2226_v31 = vmax.f32 %v2178_v57, 0.0 }
 0x61c   : > { %v2173_v44 = vadd.f32 %v2172_v0, %v4756_v12  ;;  %3459 = vmatprep.subr.bf16.mxu0 %v2243_v45  ;;  %v2224_v21 = vmax.f32 %v2170_v53, 0.0  ;;  %v5672_v45 = vmax.f32 %v5000_v59, 0.0 }
 0x61d   : > { %v2227_v22 = vmax.f32 %v2181_v1, 0.0 }
 0x61e   : > { %v2225_v25 = vmax.f32 %v2173_v44, 0.0  ;;  %v5673_v44 = vmax.f32 %v4998_v61, 0.0 }
 0x61f   : > { %v2245_v16 = vpack.c.bf16 %v2227_v22, %v2226_v31  ;;  %3460 = vmatpush3.bf16.msra.mxu0 %v5143_v19  ;;  %v5674_v22 = vmax.f32 %v4996_v36, 0.0 }
 0x620   : > { %v2244_v50 = vpack.c.bf16 %v2225_v25, %v2224_v21  ;;  %v3777_v37 = vpop.f32.mrb[92].mxu1 }
 0x621   : > { %v2194_v47 = vadd.f32 %v3777_v37, %v4764_v3  ;;  %v2185_v55 = vpop.f32.mrb[93].mxu1 }
 0x622   : > { %v2186_v46 = vadd.f32 %v2185_v55, %v4768_v4  ;;  %v3778_v63 = vpop.f32.mrb[94].mxu1  ;;  %3461 = vmatprep.subr.bf16.mxu0 %v2244_v50  ;;  %v5675_v55 = vmax.f32 %v5014_v17, 0.0 }
 0x623   : > { %v2197_v15 = vadd.f32 %v3778_v63, %v4773_v62  ;;  %v2188_v12 = vpop.f32.mrb[95].mxu1  ;;  %3462 = vmatpush3.bf16.msra.mxu0 %v5153_v29  ;;  %v2230_v49 = vmax.f32 %v2194_v47, 0.0  ;;  %v5676_v63 = vmax.f32 %v5020_v5, 0.0 }
 0x624   : > { %v2189_v11 = vadd.f32 %v2188_v12, %v4778_v26  ;;  %3463 = vmatprep.subr.bf16.mxu0 %v2245_v16  ;;  %v2228_v19 = vmax.f32 %v2186_v46, 0.0 }
 0x625   : > { %v2231_v10 = vmax.f32 %v2197_v15, 0.0 }
 0x626   : > { %v2229_v48 = vmax.f32 %v2189_v11, 0.0 }
 0x627   : > { %v2247_v52 = vpack.c.bf16 %v2231_v10, %v2230_v49  ;;  %3464 = vmatpush3.bf16.msra.mxu0 %v5151_v6 }
 0x628   : > { %v2246_v3 = vpack.c.bf16 %v2229_v48, %v2228_v19  ;;  %v5677_v48 = vmax.f32 %v5018_v8, 0.0 }
 0x62a   : > { %3465 = vmatprep.subr.bf16.mxu0 %v2246_v3  ;;  %v5678_v3 = vmax.f32 %v5016_v24, 0.0 }
 0x62b   : > { %3466 = vmatpush3.bf16.msra.mxu0 %v5161_v23 }
 0x62c   : > { %3467 = vmatprep.subr.bf16.mxu0 %v2247_v52 }
 0x62f   : > { %3468 = vmatpush3.bf16.msra.mxu0 %v5159_v58 }
 0x630   : > { %3811 = vmatprep.subr.bf16.mxu0 %v3954_v33 }
 0x632   : > { %3184 = vmatmul.mubr.msk.bf16.vlgmr.msra.gmra.mrb[80].mxu0 %vm5655_vm15, %v5564_v18 }
 0x633   : > { %3186 = vmatprep.mubr.msk.bf16.mxu0 %vm5656_vm14, %v5564_v18  ;;  %3812 = vmatpush3.bf16.msra.mxu0 %v3954_v33  ;;  %v5680_v33 = vmax.f32 %v5040_v2, 0.0 }
 0x634   : > { %3813 = vmatprep.subr.bf16.mxu0 %v3955_v28 }
 0x637   : > { %3814 = vmatpush3.bf16.msra.mxu0 %v3955_v28 }
 0x638   : > { %3815 = vmatprep.subr.bf16.mxu0 %v3956_v27 }
 0x63a   : > { %3188 = vmatmul.mubr.msk.bf16.gmra.mrb[84].mxu0 %vm5657_vm10, %v5564_v18 }
 0x63b   : > { %3190 = vmatprep.mubr.msk.bf16.mxu0 %vm5658_vm4, %v5564_v18  ;;  %3816 = vmatpush3.bf16.msra.mxu0 %v3956_v27 }
 0x63c   : > { %3817 = vmatprep.subr.bf16.mxu0 %v3957_v13 }
 0x63f   : > { %3818 = vmatpush3.bf16.msra.mxu0 %v3957_v13 }
 0x640   : > { %3819 = vmatprep.subr.bf16.mxu0 %v3958_v20 }
 0x642   : > { %3192 = vmatmul.mubr.msk.bf16.gmra.mrb[88].mxu0 %vm5659_vm6, %v5564_v18 }
 0x643   : > { %3194 = vmatprep.mubr.msk.bf16.mxu0 %vm5660_vm11, %v5564_v18  ;;  %3820 = vmatpush3.bf16.msra.mxu0 %v3958_v20 }
 0x644   : > { %3821 = vmatprep.subr.bf16.mxu0 %v3959_v42 }
 0x647   : > { %3822 = vmatpush3.bf16.msra.mxu0 %v3959_v42 }
 0x64a   : > { %3196 = vmatmul.mubr.msk.bf16.gmra.mrb[92].mxu0 %vm5661_vm12, %v5564_v18 }
 0x64b   : > { %3198 = vmatprep.mubr.msk.bf16.mxu0 %vm5662_vm1, %v5564_v18 }
 0x652   : > { %3200 = vmatmul.mubr.msk.bf16.gmra.mrb[96].mxu0 %vm5663_vm2, %v5564_v18 }
 0x653   : > { %3202 = vmatprep.mubr.msk.bf16.mxu0 %vm5664_vm8, %v5564_v18 }
 0x65a   : > { %3204 = vmatmul.mubr.msk.bf16.gmra.mrb[100].mxu0 %vm5665_vm9, %v5564_v18 }
 0x65b   : > { %3206 = vmatprep.mubr.msk.bf16.mxu0 %vm5667_vm0, %v5564_v18 }
 0x662   : > { %3208 = vmatmul.mubr.msk.bf16.gmra.mrb[104].mxu0 %vm4907_vm3, %v5564_v18 }
 0x663   : > { %3210 = vmatprep.mubr.msk.bf16.mxu0 %vm4911_vm13, %v5564_v18  ;;  %vm4037_vm13 = vmmov 0  }
 0x66a   : > { %3212 = vmatmul.mubr.msk.bf16.gmra.mrb[108].mxu0 %vm4923_vm5, %v5564_v18 }
 0x705   : > { %v3469_v6 = vpop.f32.mrb[80].mxu0 }
 0x706   : > { %v3470_v29 = vpop.f32.mrb[81].mxu0 }
 0x707   : > { %v3471_v58 = vadd.f32 %v3470_v29, %v3469_v6  ;;  %v3472_v23 = vpop.f32.mrb[82].mxu0  ;;  %v5681_v29 = vmax.f32 %v5038_v54, 0.0 }
 0x708   : > { %v3473_v9 = vpop.f32.mrb[83].mxu0 }
 0x709   : > { %v3474_v40 = vadd.f32 %v3473_v9, %v3472_v23  ;;  %v2345_v30 = vadd.f32 %v3471_v58, %v5671_v43  ;;  %v5682_v23 = vld [vmem:[#allocation6_spill] sm:$0xff] }
 0x70a   : > { %v5683_v9 = vmax.f32 %v5682_v23, 0.0 }
 0x70b   : > { %v2346_v56 = vadd.f32 %v3474_v40, %v5672_v45 }
 0x70d   : > { %v3475_v41 = vpop.f32.mrb[84].mxu0  ;;  %v2361_v57 = vpack.c.bf16 %v2346_v56, %v2345_v30 }
 0x70e   : > { %v3476_v7 = vpop.f32.mrb[85].mxu0 }
 0x70f   : > { %v3477_v53 = vadd.f32 %v3476_v7, %v3475_v41  ;;  %v3478_v51 = vpop.f32.mrb[86].mxu0  ;;  %3795 = vmatprep.mubr.bf16.mxu1 %v2361_v57  ;;  %v5684_v57 = vld [vmem:[#allocation5_spill] sm:$0xff] }
 0x710   : > { %v3479_v1 = vpop.f32.mrb[87].mxu0  ;;  %v5685_v7 = vmax.f32 %v5684_v57, 0.0 }
 0x711   : > { %v3480_v0 = vadd.f32 %v3479_v1, %v3478_v51  ;;  %v2347_v31 = vadd.f32 %v3477_v53, %v5673_v44  ;;  %v5686_v51 = vld [vmem:[#allocation41_spill] sm:$0xff] }
 0x712   : > { %v5687_v1 = vmax.f32 %v5686_v51, 0.0 }
 0x713   : > { %v2348_v21 = vadd.f32 %v3480_v0, %v5674_v22 }
 0x715   : > { %v2362_v25 = vpack.c.bf16 %v2348_v21, %v2347_v31  ;;  %v3481_v34 = vpop.f32.mrb[88].mxu0 }
 0x716   : > { %v3482_v16 = vpop.f32.mrb[89].mxu0 }
 0x717   : > { %v3483_v50 = vadd.f32 %v3482_v16, %v3481_v34  ;;  %v3484_v59 = vpop.f32.mrb[90].mxu0  ;;  %3796 = vmatmul.mubr.bf16.vlgmr.msra.gmra.mrb[96].mxu1 %v2362_v25  ;;  %v5688_v16 = vld [vmem:[#allocation40_spill] sm:$0xff] }
 0x718   : > { %v3485_v37 = vpop.f32.mrb[91].mxu0 }
 0x719   : > { %v3486_v47 = vadd.f32 %v3485_v37, %v3484_v59  ;;  %v2349_v46 = vadd.f32 %v3483_v50, %v5675_v55  ;;  %v5689_v50 = vmax.f32 %v5688_v16, 0.0  ;;  %v5690_v37 = vld [vmem:[#allocation23_spill] sm:$0xff] }
 0x71b   : > { %v2350_v15 = vadd.f32 %v3486_v47, %v5676_v63  ;;  %v5691_v47 = vmax.f32 %v5690_v37, 0.0  ;;  %v3960_v63 = vld [vmem:[%s5415_s11 + $0x70] sm:$0xff]   ;;  %v4036_v37 = vmov 0.0  }
 0x71c   : > { %3823 = vmatprep.subr.bf16.mxu0 %v3960_v63  ;;  %3843 = vmatprep.subr.bf16.mxu1 %v4036_v37 }
 0x71d   : > { %v3487_v12 = vpop.f32.mrb[92].mxu0  ;;  %v2363_v61 = vpack.c.bf16 %v2350_v15, %v2349_v46  ;;  %3824 = vmatpush3.bf16.msra.mxu0 %v3960_v63  ;;  %v3961_v15 = vld [vmem:[%s5415_s11 + $0x78] sm:$0xff]  }
 0x71e   : > { %v3488_v11 = vpop.f32.mrb[93].mxu0  ;;  %3825 = vmatprep.subr.bf16.mxu0 %v3961_v15  ;;  %v3965_v63 = vld [vmem:[%s5417_s13 + $0x18] sm:$0xff]  }
 0x71f   : > { %v3489_v49 = vadd.f32 %v3488_v11, %v3487_v12  ;;  %v3490_v36 = vpop.f32.mrb[94].mxu0  ;;  %3799 = vmatprep.mubr.bf16.mxu1 %v2363_v61  ;;  %v3230_v12 = vld [vmem:[%s5414_s10 + $0x1] ss:$0 sm:$0xff] }
 0x720   : > { %v3491_v10 = vpop.f32.mrb[95].mxu0 }
 0x721   : > { %v3492_v19 = vadd.f32 %v3491_v10, %v3490_v36  ;;  %v2351_v52 = vadd.f32 %v3489_v49, %v5677_v48  ;;  %3826 = vmatpush3.bf16.msra.mxu0 %v3961_v15  ;;  %v3966_v15 = vld [vmem:[%s5417_s13 + $0x20] sm:$0xff]  }
 0x722   : > { %3863 = vmatprep.subr.bf16.mxu0 %v4036_v37 }
 0x723   : > { %v2352_v14 = vadd.f32 %v3492_v19, %v5678_v3 }
 0x725   : > { %v3493_v4 = vpop.f32.mrb[96].mxu0  ;;  %v2364_v17 = vpack.c.bf16 %v2352_v14, %v2351_v52 }
 0x726   : > { %v3494_v62 = vpop.f32.mrb[97].mxu0 }
 0x727   : > { %v3495_v26 = vadd.f32 %v3494_v62, %v3493_v4  ;;  %v3496_v5 = vpop.f32.mrb[98].mxu0  ;;  %3800 = vmatmul.mubr.bf16.gmra.mrb[100].mxu1 %v2364_v17 }
 0x728   : > { %v3497_v38 = vpop.f32.mrb[99].mxu0 }
 0x729   : > { %v3498_v39 = vadd.f32 %v3497_v38, %v3496_v5  ;;  %v2353_v35 = vadd.f32 %v3495_v26, %v5679_v32 }
 0x72b   : > { %v2354_v28 = vadd.f32 %v3498_v39, %v5680_v33 }
 0x72d   : > { %v3499_v27 = vpop.f32.mrb[100].mxu0  ;;  %v2365_v8 = vpack.c.bf16 %v2354_v28, %v2353_v35 }
 0x72e   : > { %v3500_v13 = vpop.f32.mrb[101].mxu0 }
 0x72f   : > { %v3501_v20 = vadd.f32 %v3500_v13, %v3499_v27  ;;  %v3502_v24 = vpop.f32.mrb[102].mxu0  ;;  %3803 = vmatprep.mubr.bf16.mxu1 %v2365_v8 }
 0x730   : > { %v3503_v42 = vpop.f32.mrb[103].mxu0 }
 0x731   : > { %v3504_v6 = vadd.f32 %v3503_v42, %v3502_v24  ;;  %v2355_v58 = vadd.f32 %v3501_v20, %v5681_v29 }
 0x733   : > { %v2356_v40 = vadd.f32 %v3504_v6, %v5683_v9 }
 0x735   : > { %v3505_v43 = vpop.f32.mrb[104].mxu0  ;;  %v2366_v60 = vpack.c.bf16 %v2356_v40, %v2355_v58 }
 0x736   : > { %v3506_v30 = vpop.f32.mrb[105].mxu0 }
 0x737   : > { %v3507_v45 = vadd.f32 %v3506_v30, %v3505_v43  ;;  %v3508_v2 = vpop.f32.mrb[106].mxu0  ;;  %3804 = vmatmul.mubr.bf16.gmra.mrb[104].mxu1 %v2366_v60 }
 0x738   : > { %v3509_v56 = vpop.f32.mrb[107].mxu0 }
 0x739   : > { %v3510_v41 = vadd.f32 %v3509_v56, %v3508_v2  ;;  %v2357_v53 = vadd.f32 %v3507_v45, %v5685_v7 }
 0x73b   : > { %v2358_v0 = vadd.f32 %v3510_v41, %v5687_v1 }
 0x73d   : > { %v3511_v44 = vpop.f32.mrb[108].mxu0  ;;  %v2367_v54 = vpack.c.bf16 %v2358_v0, %v2357_v53 }
 0x73e   : > { %v3512_v31 = vpop.f32.mrb[109].mxu0 }
 0x73f   : > { %v3513_v22 = vadd.f32 %v3512_v31, %v3511_v44  ;;  %v3514_v21 = vpop.f32.mrb[110].mxu0  ;;  %3807 = vmatprep.mubr.bf16.mxu1 %v2367_v54 }
 0x740   : > { %v3515_v25 = vpop.f32.mrb[111].mxu0 }
 0x741   : > { %v3516_v34 = vadd.f32 %v3515_v25, %v3514_v21  ;;  %v2359_v59 = vadd.f32 %v3513_v22, %v5689_v50 }
 0x743   : > { %v2360_v55 = vadd.f32 %v3516_v34, %v5691_v47  ;;  %v3962_v47 = vld [vmem:[%s5417_s13] sm:$0xff]  }
 0x745   : > { %v2368_v46 = vpack.c.bf16 %v2360_v55, %v2359_v59  ;;  %v3963_v55 = vld [vmem:[%s5417_s13 + $0x8] sm:$0xff]  }
 0x747   : > { %3808 = vmatmul.mubr.bf16.gmra.mrb[108].mxu1 %v2368_v46  ;;  %v3964_v46 = vld [vmem:[%s5417_s13 + $0x10] sm:$0xff]  }
 0x748   : > { %3859 = vmatprep.mubr.msk.bf16.mxu1 %vm4037_vm13, %v4036_v37 }
 0x7ea   : > { %v3797_v61 = vpop.f32.mrb[96].mxu1 }
 0x7eb   : > { %v2485_v11 = vadd.f32 %v3797_v61, %v3230_v12  ;;  %v2476_v49 = vpop.f32.mrb[97].mxu1  ;;  %v3968_v61 = vld [vmem:[%s5417_s13 + $0x30] sm:$0xff]  }
 0x7ec   : > { %v2477_v36 = vadd.f32 %v3230_v12, %v2476_v49  ;;  %v3798_v10 = vpop.f32.mrb[98].mxu1 }
 0x7ed   : > { %v2488_v19 = vadd.f32 %v3798_v10, %v3230_v12  ;;  %v2479_v48 = vpop.f32.mrb[99].mxu1  ;;  %v2541_v3 = vmax.f32 %v2485_v11, 0.0  ;;  %v3256_v11 = vld [vmem:[%s5416_s12 + $0x1] ss:$0 sm:$0xff] }
 0x7ee   : > { %v2480_v52 = vadd.f32 %v3230_v12, %v2479_v48  ;;  %v2539_v4 = vmax.f32 %v2477_v36, 0.0 }
 0x7ef   : > { %v2542_v14 = vmax.f32 %v2488_v19, 0.0 }
 0x7f0   : > { %v2540_v17 = vmax.f32 %v2480_v52, 0.0 }
 0x7f1   : > { %v2556_v62 = vpack.c.bf16 %v2542_v14, %v2541_v3 }
 0x7f2   : > { %v2555_v26 = vpack.c.bf16 %v2540_v17, %v2539_v4 }
 0x7f4   : > { %3827 = vmatprep.mubr.bf16.mxu0 %v2555_v26 }
 0x7f5   : > { %3828 = vmatmul.mubr.bf16.vlgmr.msra.gmra.mrb[112].mxu0 %v2556_v62 }
 0x7f6   : > { %3864 = vmatpush3.bf16.msra.mxu0 %v3962_v47 }
 0x7f7   : > { %3865 = vmatprep.subr.bf16.mxu0 %v4036_v37 }
 0x7fa   : > { %v3801_v5 = vpop.f32.mrb[100].mxu1  ;;  %3866 = vmatpush3.bf16.msra.mxu0 %v3963_v55 }
 0x7fb   : > { %v2501_v38 = vadd.f32 %v3801_v5, %v3230_v12  ;;  %v2492_v39 = vpop.f32.mrb[101].mxu1  ;;  %3867 = vmatprep.subr.bf16.mxu0 %v4036_v37 }
 0x7fc   : > { %v2493_v32 = vadd.f32 %v3230_v12, %v2492_v39  ;;  %v3802_v35 = vpop.f32.mrb[102].mxu1 }
 0x7fd   : > { %v2504_v33 = vadd.f32 %v3802_v35, %v3230_v12  ;;  %v2495_v28 = vpop.f32.mrb[103].mxu1  ;;  %v2545_v8 = vmax.f32 %v2501_v38, 0.0 }
 0x7fe   : > { %v2496_v27 = vadd.f32 %v3230_v12, %v2495_v28  ;;  %v2543_v20 = vmax.f32 %v2493_v32, 0.0  ;;  %3868 = vmatpush3.bf16.msra.mxu0 %v3964_v46  ;;  %v3040_v46 = vld [vmem:[%s563_s25] ss:$0 sm:$0xff]  ;;  %s2924_s25 = sshll.u32 %s541_s2, 4  ;;  %s5364_s25 = int_to_ptr.vmem [resolvable:$true] %s2924_s25 }
 0x7ff   : > { %v2546_v13 = vmax.f32 %v2504_v33, 0.0  ;;  %3869 = vmatprep.subr.bf16.mxu0 %v4036_v37  ;;  %s3970_s22 = scalar_lea.vmem %s5364_s25, 64  ;;  %p3977_p0 = scmp.lt.s32.totalorder %s5364_s25, %s3975_s26 }
 0x800   : > { %v2544_v24 = vmax.f32 %v2496_v27, 0.0  ;;  %p3971_p11 = scmp.ne.s32.totalorder %s5364_s25, %s3970_s22  ;;  %p3978_p1 = scmp.lt.s32.totalorder %s3976_s30, %s3970_s22 }
 0x801   : > { %v2558_v42 = vpack.c.bf16 %v2546_v13, %v2545_v8 }
 0x802   : > { %v2557_v6 = vpack.c.bf16 %v2544_v24, %v2543_v20  ;;  %3870 = vmatpush3.bf16.msra.mxu0 %v3965_v63  ;;  %v5692_v63 = vld [vmem:[#allocation22_spill] sm:$0xff]  ;;  %p3972_p12 = pnand %p3971_p11, %p4157_p5  ;;  %p3979_p2 = por %p3978_p1, %p3977_p0 }
 0x803   : > { %3871 = vmatprep.subr.bf16.mxu0 %v4036_v37  ;;  %vm886_vm3 = vcmp.eq.s32.totalorder %v5692_v63, %v3040_v46 }
 0x804   : > { %3831 = vmatprep.mubr.bf16.mxu0 %v2557_v6  ;;  %vm3265_vm5 = vmpackc.low %vm886_vm3, %vm886_vm3  ;;  %p3973_p13 = pneg %p3972_p12 }
 0x805   : > { %3832 = vmatmul.mubr.bf16.gmra.mrb[116].mxu0 %v2558_v42 }
 0x806   : > { %3872 = vmatpush3.bf16.msra.mxu0 %v3966_v15  ;;  %v3969_v15 = vld [vmem:[%s5417_s13 + $0x38] sm:$0xff]   ;;  %p3980_p3 = pnand %p3979_p2, %p3973_p13 }
 0x807   : > { %3873 = vmatprep.subr.bf16.mxu0 %v4036_v37 }
 0x80a   : > { %v3805_v29 = vpop.f32.mrb[104].mxu1 }
 0x80b   : > { %v2517_v58 = vadd.f32 %v3805_v29, %v3230_v12  ;;  %v2508_v23 = vpop.f32.mrb[105].mxu1 }
 0x80c   : > { %v2509_v9 = vadd.f32 %v3230_v12, %v2508_v23  ;;  %v3806_v40 = vpop.f32.mrb[106].mxu1 }
 0x80d   : > { %v2520_v43 = vadd.f32 %v3806_v40, %v3230_v12  ;;  %v2511_v60 = vpop.f32.mrb[107].mxu1  ;;  %v2549_v45 = vmax.f32 %v2517_v58, 0.0 }
 0x80e   : > { %v2512_v30 = vadd.f32 %v3230_v12, %v2511_v60  ;;  %v2547_v56 = vmax.f32 %v2509_v9, 0.0 }
 0x80f   : > { %v2550_v2 = vmax.f32 %v2520_v43, 0.0 }
 0x810   : > { %v2548_v41 = vmax.f32 %v2512_v30, 0.0 }
 0x811   : > { %v2560_v57 = vpack.c.bf16 %v2550_v2, %v2549_v45 }
 0x812   : > { %v2559_v7 = vpack.c.bf16 %v2548_v41, %v2547_v56 }
 0x814   : > { %3835 = vmatprep.mubr.bf16.mxu0 %v2559_v7 }
 0x815   : > { %3836 = vmatmul.mubr.bf16.gmra.mrb[120].mxu0 %v2560_v57 }
 0x81a   : > { %v3809_v53 = vpop.f32.mrb[108].mxu1 }
 0x81b   : > { %v2533_v51 = vadd.f32 %v3809_v53, %v3230_v12  ;;  %v2524_v1 = vpop.f32.mrb[109].mxu1 }
 0x81c   : > { %v2525_v0 = vadd.f32 %v3230_v12, %v2524_v1  ;;  %v3810_v44 = vpop.f32.mrb[110].mxu1 }
 0x81d   : > { %v2536_v54 = vadd.f32 %v3810_v44, %v3230_v12  ;;  %v2527_v31 = vpop.f32.mrb[111].mxu1  ;;  %v2553_v21 = vmax.f32 %v2533_v51, 0.0 }
 0x81e   : > { %v2528_v22 = vadd.f32 %v3230_v12, %v2527_v31  ;;  %v2551_v34 = vmax.f32 %v2525_v0, 0.0  ;;  %v3967_v12 = vld [vmem:[%s5417_s13 + $0x28] sm:$0xff]  }
 0x81f   : > { %v2554_v25 = vmax.f32 %v2536_v54, 0.0  ;;  %3874 = vmatpush3.bf16.msra.mxu0 %v3967_v12 }
 0x820   : > { %v2552_v16 = vmax.f32 %v2528_v22, 0.0  ;;  %3875 = vmatprep.subr.bf16.mxu0 %v4036_v37 }
 0x821   : > { %v2562_v50 = vpack.c.bf16 %v2554_v25, %v2553_v21 }
 0x822   : > { %v2561_v59 = vpack.c.bf16 %v2552_v16, %v2551_v34 }
 0x823   : > { %3876 = vmatpush3.bf16.msra.mxu0 %v3968_v61 }
 0x824   : > { %3839 = vmatprep.mubr.bf16.mxu0 %v2561_v59  ;;  %3877 = vmatprep.subr.bf16.mxu0 %v4036_v37 }
 0x825   : > { %3840 = vmatmul.mubr.bf16.gmra.mrb[124].mxu0 %v2562_v50 }
 0x826   : > { %3879 = vmatprep.mubr.msk.bf16.mxu0 %vm4037_vm13, %v4036_v37 }
 0x827   : > { %3878 = vmatpush3.bf16.msra.mxu0 %v3969_v15 }
 0x8c8   : > { %v3829_v49 = vpop.f32.mrb[112].mxu0 }
 0x8c9   : > { %v2679_v36 = vadd.f32 %v3829_v49, %v3256_v11  ;;  %v2670_v10 = vpop.f32.mrb[113].mxu0 }
 0x8ca   : > { %v2671_v19 = vadd.f32 %v3256_v11, %v2670_v10  ;;  %v3830_v48 = vpop.f32.mrb[114].mxu0 }
 0x8cb   : > { %v2682_v52 = vadd.f32 %v3830_v48, %v3256_v11  ;;  %v2673_v3 = vpop.f32.mrb[115].mxu0  ;;  %v2735_v4 = vmax.f32 %v2679_v36, 0.0 }
 0x8cc   : > { %v2674_v14 = vadd.f32 %v3256_v11, %v2673_v3  ;;  %v2733_v62 = vmax.f32 %v2671_v19, 0.0 }
 0x8cd   : > { %v2736_v17 = vmax.f32 %v2682_v52, 0.0 }
 0x8ce   : > { %v2734_v26 = vmax.f32 %v2674_v14, 0.0 }
 0x8cf   : > { %v2750_v5 = vpack.c.bf16 %v2736_v17, %v2735_v4 }
 0x8d0   : > { %v2749_v38 = vpack.c.bf16 %v2734_v26, %v2733_v62 }
 0x8d2   : > { %3844 = vmatpush3.bf16.msra.mxu1 %v2749_v38 }
 0x8d3   : > { %3845 = vmatprep.subr.bf16.mxu1 %v4036_v37 }
 0x8d6   : > { %3846 = vmatpush3.bf16.msra.mxu1 %v2750_v5 }
 0x8d7   : > { %3847 = vmatprep.subr.bf16.mxu1 %v4036_v37 }
 0x8d8   : > { %v3833_v39 = vpop.f32.mrb[116].mxu0 }
 0x8d9   : > { %v2695_v32 = vadd.f32 %v3833_v39, %v3256_v11  ;;  %v2686_v35 = vpop.f32.mrb[117].mxu0 }
 0x8da   : > { %v2687_v33 = vadd.f32 %v3256_v11, %v2686_v35  ;;  %v3834_v28 = vpop.f32.mrb[118].mxu0 }
 0x8db   : > { %v2698_v27 = vadd.f32 %v3834_v28, %v3256_v11  ;;  %v2689_v8 = vpop.f32.mrb[119].mxu0  ;;  %v2739_v20 = vmax.f32 %v2695_v32, 0.0 }
 0x8dc   : > { %v2690_v13 = vadd.f32 %v3256_v11, %v2689_v8  ;;  %v2737_v42 = vmax.f32 %v2687_v33, 0.0 }
 0x8dd   : > { %v2740_v24 = vmax.f32 %v2698_v27, 0.0 }
 0x8de   : > { %v2738_v6 = vmax.f32 %v2690_v13, 0.0 }
 0x8df   : > { %v2752_v29 = vpack.c.bf16 %v2740_v24, %v2739_v20 }
 0x8e0   : > { %v2751_v58 = vpack.c.bf16 %v2738_v6, %v2737_v42 }
 0x8e2   : > { %3848 = vmatpush3.bf16.msra.mxu1 %v2751_v58 }
 0x8e3   : > { %3849 = vmatprep.subr.bf16.mxu1 %v4036_v37 }
 0x8e6   : > { %3850 = vmatpush3.bf16.msra.mxu1 %v2752_v29 }
 0x8e7   : > { %3851 = vmatprep.subr.bf16.mxu1 %v4036_v37 }
 0x8e8   : > { %v3837_v23 = vpop.f32.mrb[120].mxu0 }
 0x8e9   : > { %v2711_v9 = vadd.f32 %v3837_v23, %v3256_v11  ;;  %v2702_v40 = vpop.f32.mrb[121].mxu0 }
 0x8ea   : > { %v2703_v43 = vadd.f32 %v3256_v11, %v2702_v40  ;;  %v3838_v60 = vpop.f32.mrb[122].mxu0 }
 0x8eb   : > { %v2714_v30 = vadd.f32 %v3838_v60, %v3256_v11  ;;  %v2705_v45 = vpop.f32.mrb[123].mxu0  ;;  %v2743_v56 = vmax.f32 %v2711_v9, 0.0 }
 0x8ec   : > { %v2706_v2 = vadd.f32 %v3256_v11, %v2705_v45  ;;  %v2741_v57 = vmax.f32 %v2703_v43, 0.0 }
 0x8ed   : > { %v2744_v41 = vmax.f32 %v2714_v30, 0.0 }
 0x8ee   : > { %v2742_v7 = vmax.f32 %v2706_v2, 0.0 }
 0x8ef   : > { %v2754_v53 = vpack.c.bf16 %v2744_v41, %v2743_v56 }
 0x8f0   : > { %v2753_v51 = vpack.c.bf16 %v2742_v7, %v2741_v57 }
 0x8f2   : > { %3852 = vmatpush3.bf16.msra.mxu1 %v2753_v51 }
 0x8f3   : > { %3853 = vmatprep.subr.bf16.mxu1 %v4036_v37 }
 0x8f6   : > { %3854 = vmatpush3.bf16.msra.mxu1 %v2754_v53 }
 0x8f7   : > { %3855 = vmatprep.subr.bf16.mxu1 %v4036_v37 }
 0x8f8   : > { %v3841_v1 = vpop.f32.mrb[124].mxu0 }
 0x8f9   : > { %v2727_v0 = vadd.f32 %v3841_v1, %v3256_v11  ;;  %v2718_v44 = vpop.f32.mrb[125].mxu0 }
 0x8fa   : > { %v2719_v54 = vadd.f32 %v3256_v11, %v2718_v44  ;;  %v3842_v31 = vpop.f32.mrb[126].mxu0 }
 0x8fb   : > { %v2730_v22 = vadd.f32 %v3842_v31, %v3256_v11  ;;  %v2721_v21 = vpop.f32.mrb[127].mxu0  ;;  %v2747_v34 = vmax.f32 %v2727_v0, 0.0 }
 0x8fc   : > { %v2722_v25 = vadd.f32 %v3256_v11, %v2721_v21  ;;  %v2745_v50 = vmax.f32 %v2719_v54, 0.0 }
 0x8fd   : > { %v2748_v16 = vmax.f32 %v2730_v22, 0.0 }
 0x8fe   : > { %v2746_v59 = vmax.f32 %v2722_v25, 0.0 }
 0x8ff   : > { %v2756_v47 = vpack.c.bf16 %v2748_v16, %v2747_v34 }
 0x900   : > { %v2755_v55 = vpack.c.bf16 %v2746_v59, %v2745_v50 }
 0x902   : > { %3856 = vmatpush3.bf16.msra.mxu1 %v2755_v55 }
 0x903   : > { %3857 = vmatprep.subr.bf16.mxu1 %v4036_v37  ;;  %v3267_v37 = vld [vmem:[%s5418_s14] ss:$0 sm:$0xff] }
 0x906   : > { %3858 = vmatpush3.bf16.msra.mxu1 %v2756_v47 }
 0x909   : > { %3860 = vmatmul.mubr.msk.bf16.vlgmr.msra.gmra.mrb[112].mxu1 %vm3265_vm5, %v5564_v18 }
 0x9dc   : > { %v2791_v12 = vpop.f32.mrb[112].mxu1 }
 0x9dd   : > { %v2797_v61 = vpack.c.bf16 %v2791_v12, %v2791_v12  ;;  %v3861_v11 = vpop.f32.mrb[113].mxu1 }
 0x9de   : > { %v2794_v49 = vpop.f32.mrb[114].mxu1 }
 0x9df   : > { %v3862_v36 = vpop.f32.mrb[115].mxu1  ;;  %3880 = vmatmul.mubr.bf16.vlgmr.msra.gmra.mrb[128].mxu0 %v2797_v61 }
 0xab2   : > { %v2903_v18 = vpop.f32.mrb[128].mxu0 }
 0xab3   : > { %v2904_v10 = vadd.f32 %v3267_v37, %v2903_v18  ;;  %v3881_v19 = vpop.f32.mrb[129].mxu0 }
 0xab4   : > { %v2906_v48 = vpop.f32.mrb[130].mxu0 }
 0xab5   : > { %2909 = vst [vmem:[%s541_s2] sm:$0xf] %v2904_v10  ;;  %v3882_v52 = vpop.f32.mrb[131].mxu0 }
 0xab6   : > { %3983 = shalt.err (!%p3980_p3)
}
 0xab7   : > { %s3984_s17 = scalar_lea.hbm %s5362_s3, 64  ;;  %s3988_s1 = scalar_lea.hbm %s5419_s15, 128 }
 0xab8   : > { %p3985_p4 = scmp.ne.s32.totalorder %s5362_s3, %s3984_s17  ;;  %p3989_p9 = scmp.lt.u32.totalorder %s5362_s3, %s5419_s15 }
 0xab9   : > { %p3990_p10 = scmp.lt.u32.totalorder %s3988_s1, %s3984_s17  ;;  %p3992_p12 = scmp.lt.u32.totalorder %s3984_s17, %s5362_s3 }
 0xaba   : > { %p3986_p7 = pnand %p3985_p4, %p4157_p5 }
 0xabb   : > { %p3991_p11 = por %p3990_p10, %p3989_p9 }
 0xabc   : > { %p3987_p8 = pneg %p3986_p7 }
 0xabd   : > { %p3993_p13 = por %p3992_p12, %p3991_p11 }
 0xabf   : > { %p3994_p0 = pnand %p3993_p13, %p3987_p8 }
 0xac1   : > { %3997 = shalt.err (!%p3994_p0)
}
 0xac2   : > { %3885 = dma.vmem_to_hbm [thread:$0]  (%p4157_p5), %s5364_s25, 64, %s5362_s3, %s2911_s23  }
 0xac3 PF: > { %p3891_p1 = scmp.ge.s32.totalorder %s4032_s21, 2  ;;  %s2936_s22 = sand.u32 1, %s4020_s18  }
 0xac4   : > { %s2937_s30 = scalar_lea.sflag [#allocation3], %s2936_s22 }
 0xac5   : > { %p3888_p2 = pnand %p3891_p1, %p4161_p6 }
 0xac7   : > { %4015 = dma.done.wait (!%p3888_p2), %s2937_s30, 64  }
 0xac8   : > { %4017 = vsyncadd (!%p3888_p2), %s2937_s30, 4294967232  ;;  %p25_p3 = scmp.ge.s32.totalorder %s4144_s24, 4   ;;  %s5693_s18 = smov %s4024_s19 }
 0xac9   : > { %s5694_s19 = smov %s4028_s20  ;;  %s5695_s20 = smov %s4155_s27 }
 0xaca   : > { %s5696_s21 = smov %s4144_s24  ;;  %27 = sbr.rel (!%p25_p3) target bundleno = 8 (0x8), region = 131 }
 0xad1   :  { %2942 = vsyncpa [#allocation3], 1 }
 0xad2   :  { %2944 = vsyncpa [#allocation3 + $0x1], 1 }

</bundles_post_ra>
